<compile_context>
chip_gen: v6e
topology: v6e:2x2x1
jax: 0.10.0
libtpu: 0.0.40
codegen_flags: <defaults>
</compile_context>

<pallas_src>
import jax
import jax.numpy as jnp
import numpy as np
from jax.experimental import pallas as pl
from jax.experimental.pallas import tpu as pltpu

IN_FEAT = 52      # 16*2 (conditioning collapsed) + 4 (pedal) + 16 (z)
HID1 = 32         # linear out / GRU in
HID2 = 64         # GRU hidden
OUT_FEAT = 32     # dense_out
LN_EPS = 1e-5
NEG_SLOPE = 0.1   # module explicitly uses nn.LeakyReLU(0.1)


def context_kernel(cond_ref, pedal_ref, z_ref,
                   w1c_ref, w1p_ref, w1z_ref, b1_ref,
                   wih_ref, preb_ref, whh_ref, bhn_ref,
                   w2_ref, b2_ref,
                   out_ref,
                   pre_ref, h_all_ref):
    B, T, _ = out_ref.shape
    H = HID2

    # ---- Batched pre-pass (off the serial chain) --------------------------------
    # Linear(52->32) built from the three input pieces (no wrapper concat), then
    # LeakyReLU(0.1), then ONE fused input-side GRU matmul (32, 192) with the r/z
    # hidden biases folded in ([b_ir+b_hr | b_iz+b_hz | b_in]).
    g = (jnp.dot(cond_ref[...], w1c_ref[...], preferred_element_type=jnp.float32)
         + jnp.dot(pedal_ref[...], w1p_ref[...], preferred_element_type=jnp.float32)
         + jnp.dot(z_ref[...], w1z_ref[...], preferred_element_type=jnp.float32)
         + b1_ref[...])                                   # (B*T, 32), batch-major rows
    g = jnp.where(g >= 0.0, g, NEG_SLOPE * g)             # LeakyReLU(0.1)

    gi = (jnp.dot(g, wih_ref[...], preferred_element_type=jnp.float32)
          + preb_ref[...])                                # (B*T, 192), [r|z|n]
    gi3 = gi.reshape(B, T, 3 * H)                         # free split of leading dim

    # One-time static scatter: batch-major -> time-major packed pre-activation slab.
    for t in range(T):                                    # T is small & static
        pre_ref[t] = gi3[:, t, :]                         # (B, 192) per step

    whh = whh_ref[...]                                    # (64, 192) packed [r|z|n]
    bhn = bhn_ref[...]                                     # (1, 64)

    # ---- Serial GRU recurrence (PyTorch gate order r, z, n) ----------------------
    # Critical path per step: ONE fused MXU dot, ONE 128-lane sigmoid, one tanh,
    # plus a handful of VALU ops.  Gate extraction = static lane slices (XLU).
    def body(t, h):
        gh = jnp.dot(h, whh, preferred_element_type=jnp.float32)     # (B, 192)
        pre_t = pre_ref[t]                                            # (B, 192)
        rz = jax.nn.sigmoid(pre_t[:, :2 * H] + gh[:, :2 * H])         # single 128-lane sigmoid
        r = rz[:, :H]
        zt = rz[:, H:]
        n = jnp.tanh(pre_t[:, 2 * H:] + r * (gh[:, 2 * H:] + bhn))    # b_hn must stay inside r*(.)
        h_new = (1.0 - zt) * n + zt * h
        h_all_ref[t] = h_new
        return h_new

    h0 = jnp.zeros((B, H), jnp.float32)
    # T is small & static here; fully unroll for LLO scheduler visibility.
    jax.lax.fori_loop(0, T, body, h0, unroll=True)

    # ---- Post-pass: LayerNorm (affine folded into w2'/b2') + Linear(64->32) ------
    # Per-batch (B is tiny) so the output is written directly in (B, T, 32) layout:
    # no output transpose in the wrapper.
    hs = h_all_ref[...]                                   # (T, B, 64) time-major
    w2 = w2_ref[...]
    b2 = b2_ref[...]
    for b in range(B):                                    # static, B small
        h_b = hs[:, b, :]                                 # (T, 64) static slice
        mu = jnp.mean(h_b, axis=-1, keepdims=True)
        var = jnp.mean((h_b - mu) ** 2, axis=-1, keepdims=True)
        hn = (h_b - mu) * jax.lax.rsqrt(var + LN_EPS)
        out_ref[b] = jnp.dot(hn, w2, preferred_element_type=jnp.float32) + b2


def context_network_pallas(conditioning, pedal, z, params):
    b, T = conditioning.shape[0], conditioning.shape[1]
    H = HID2

    # collapse_last_axis: (b, T, 16, 2) -> rows of 32; flattening (b, T) into rows is
    # batch-major (row = b*T + t) and free for pedal / z.
    n_c = conditioning.shape[2] * conditioning.shape[3]
    n_p = pedal.shape[-1]
    cond2 = conditioning.reshape(b * T, n_c)
    pedal2 = pedal.reshape(b * T, n_p)
    z2 = z.reshape(b * T, z.shape[-1])

    # --- one-time parameter prep (wrapper side) ---
    # Split the first Linear's rows per input piece so the kernel never needs a concat.
    w1 = params["w1"]
    w1_c = w1[:n_c]
    w1_p = w1[n_c:n_c + n_p]
    w1_z = w1[n_c + n_p:]
    # GRU biases: b_hr / b_hz fold into the pre-pass; b_hn must stay inside r*(W_hn h + b_hn).
    bih, bhh = params["bih"], params["bhh"]
    pre_b = jnp.concatenate([bih[:, :2 * H] + bhh[:, :2 * H], bih[:, 2 * H:]], axis=-1)  # (1, 192)
    bhn = bhh[:, 2 * H:]                                                                  # (1, 64)
    # Fold LayerNorm affine into the output projection.
    w2f = params["gamma"].reshape(H, 1) * params["w2"]          # diag(gamma) @ w2
    b2f = params["beta"] @ params["w2"] + params["b2"]          # beta @ w2 + b2

    args = (cond2, pedal2, z2, w1_c, w1_p, w1_z, params["b1"],
            params["wih"], pre_b, params["whh"], bhn, w2f, b2f)

    vmem_spec = pl.BlockSpec(memory_space=pltpu.MemorySpace.VMEM)
    out = pl.pallas_call(
        context_kernel,
        out_shape=jax.ShapeDtypeStruct((b, T, OUT_FEAT), jnp.float32),
        in_specs=[vmem_spec] * len(args),
        out_specs=vmem_spec,
        scratch_shapes=[
            pltpu.VMEM((T, b, 3 * H), jnp.float32),   # packed pre-activations [r|z|n], time-major
            pltpu.VMEM((T, b, H), jnp.float32),       # h_t, time-major
        ],
    )(*args)
    return out  # already (B, T, 32)


def context_network_ref(conditioning, pedal, z, params):
    """Pure-JAX reference with identical semantics (for correctness check)."""
    b, T = conditioning.shape[0], conditioning.shape[1]
    cond_flat = conditioning.reshape(b, T, -1)
    x = jnp.concatenate([cond_flat, pedal, z], axis=-1).astype(jnp.float32)
    g = x @ params["w1"] + params["b1"]
    g = jnp.where(g >= 0.0, g, NEG_SLOPE * g)

    H = HID2

    def step(h, xt):
        gi = xt @ params["wih"] + params["bih"]
        gh = h @ params["whh"] + params["bhh"]
        r = jax.nn.sigmoid(gi[:, 0:H] + gh[:, 0:H])
        zt = jax.nn.sigmoid(gi[:, H:2 * H] + gh[:, H:2 * H])
        n = jnp.tanh(gi[:, 2 * H:3 * H] + r * gh[:, 2 * H:3 * H])
        h_new = (1.0 - zt) * n + zt * h
        return h_new, h_new

    h0 = jnp.zeros((b, H), jnp.float32)
    _, hs = jax.lax.scan(step, h0, jnp.transpose(g, (1, 0, 2)))   # (T, B, 64)
    hs = jnp.transpose(hs, (1, 0, 2))                              # (B, T, 64)

    mu = jnp.mean(hs, axis=-1, keepdims=True)
    var = jnp.mean((hs - mu) ** 2, axis=-1, keepdims=True)
    hn = (hs - mu) * jax.lax.rsqrt(var + LN_EPS) * params["gamma"] + params["beta"]
    return hn @ params["w2"] + params["b2"]


def init_params(key):
    ks = jax.random.split(key, 8)
    scale = 0.1
    params = {
        # Linear(52, 32): stored as (in, out); biases as (1, out) for TPU-friendly 2D.
        "w1": scale * jax.random.normal(ks[0], (IN_FEAT, HID1), jnp.float32),
        "b1": scale * jax.random.normal(ks[1], (1, HID1), jnp.float32),
        # GRU(32, 64): weight_ih (in, 3H), weight_hh (H, 3H), gate order [r|z|n].
        # NOTE: real torch.nn.GRU stores (3H, in); transpose + keep [r|z|n] order when porting.
        "wih": scale * jax.random.normal(ks[2], (HID1, 3 * HID2), jnp.float32),
        "whh": scale * jax.random.normal(ks[3], (HID2, 3 * HID2), jnp.float32),
        "bih": scale * jax.random.normal(ks[4], (1, 3 * HID2), jnp.float32),
        "bhh": scale * jax.random.normal(ks[5], (1, 3 * HID2), jnp.float32),
        # LayerNorm(64): init like PyTorch (ones / zeros).
        "gamma": jnp.ones((1, HID2), jnp.float32),
        "beta": jnp.zeros((1, HID2), jnp.float32),
        # Linear(64, 32)
        "w2": scale * jax.random.normal(ks[6], (HID2, OUT_FEAT), jnp.float32),
        "b2": scale * jax.random.normal(ks[7], (1, OUT_FEAT), jnp.float32),
    }
    return params


if __name__ == "__main__":
    key = jax.random.PRNGKey(0)
    kp, kc, kpd, kz = jax.random.split(key, 4)

    B, T = 2, 8
    conditioning = jax.random.normal(kc, (B, T, 16, 2), jnp.float32)
    pedal = jax.random.normal(kpd, (B, T, 4), jnp.float32)
    z = jax.random.normal(kz, (B, T, 16), jnp.float32)

    params = init_params(kp)

    out = context_network_pallas(conditioning, pedal, z, params)
    out = jax.block_until_ready(out)

    ref = jax.block_until_ready(context_network_ref(conditioning, pedal, z, params))
    np.testing.assert_allclose(np.asarray(out), np.asarray(ref), rtol=3e-4, atol=1e-4)

    assert out.shape == (B, T, OUT_FEAT)
    print("KERNEL_OK")
</pallas_src>

<mosaic_0001>
module attributes {stable_mosaic.version = 11 : i64} {
  func.func @context_kernel(%arg0: memref<16x32xf32, #tpu.memory_space<vmem>>, %arg1: memref<16x4xf32, #tpu.memory_space<vmem>>, %arg2: memref<16x16xf32, #tpu.memory_space<vmem>>, %arg3: memref<32x32xf32, #tpu.memory_space<vmem>>, %arg4: memref<4x32xf32, #tpu.memory_space<vmem>>, %arg5: memref<16x32xf32, #tpu.memory_space<vmem>>, %arg6: memref<1x32xf32, #tpu.memory_space<vmem>>, %arg7: memref<32x192xf32, #tpu.memory_space<vmem>>, %arg8: memref<1x192xf32, #tpu.memory_space<vmem>>, %arg9: memref<64x192xf32, #tpu.memory_space<vmem>>, %arg10: memref<1x64xf32, #tpu.memory_space<vmem>>, %arg11: memref<64x32xf32, #tpu.memory_space<vmem>>, %arg12: memref<1x32xf32, #tpu.memory_space<vmem>>, %arg13: memref<2x8x32xf32, #tpu.memory_space<vmem>>, %arg14: memref<8x2x192xf32, #tpu.memory_space<vmem>>, %arg15: memref<8x2x64xf32, #tpu.memory_space<vmem>>) attributes {dimension_semantics = [], scalar_prefetch = 0 : i64, scratch_operands = 2 : i64, tpu.core_type = #tpu.core_type<tc>} {
    %c0 = arith.constant 0 : index
    %c0_0 = arith.constant 0 : index
    %0 = vector.load %arg0[%c0, %c0_0] : memref<16x32xf32, #tpu.memory_space<vmem>>, vector<16x32xf32>
    %c0_1 = arith.constant 0 : index
    %c0_2 = arith.constant 0 : index
    %1 = vector.load %arg3[%c0_1, %c0_2] : memref<32x32xf32, #tpu.memory_space<vmem>>, vector<32x32xf32>
    %cst = arith.constant dense<0.000000e+00> : vector<16x32xf32>
    %2 = tpu.matmul %0, %1, %cst {dimension_numbers = #tpu.dot_dimension_numbers<[1], [0], [0], [1], [0, 0, 1, 1], [], []>} : vector<16x32xf32>, vector<32x32xf32>, vector<16x32xf32> -> vector<16x32xf32>
    %c0_3 = arith.constant 0 : index
    %c0_4 = arith.constant 0 : index
    %3 = vector.load %arg1[%c0_3, %c0_4] : memref<16x4xf32, #tpu.memory_space<vmem>>, vector<16x4xf32>
    %c0_5 = arith.constant 0 : index
    %c0_6 = arith.constant 0 : index
    %4 = vector.load %arg4[%c0_5, %c0_6] : memref<4x32xf32, #tpu.memory_space<vmem>>, vector<4x32xf32>
    %cst_7 = arith.constant dense<0.000000e+00> : vector<16x32xf32>
    %5 = tpu.matmul %3, %4, %cst_7 {dimension_numbers = #tpu.dot_dimension_numbers<[1], [0], [0], [1], [0, 0, 1, 1], [], []>} : vector<16x4xf32>, vector<4x32xf32>, vector<16x32xf32> -> vector<16x32xf32>
    %6 = arith.addf %2, %5 : vector<16x32xf32>
    %c0_8 = arith.constant 0 : index
    %c0_9 = arith.constant 0 : index
    %7 = vector.load %arg2[%c0_8, %c0_9] : memref<16x16xf32, #tpu.memory_space<vmem>>, vector<16x16xf32>
    %c0_10 = arith.constant 0 : index
    %c0_11 = arith.constant 0 : index
    %8 = vector.load %arg5[%c0_10, %c0_11] : memref<16x32xf32, #tpu.memory_space<vmem>>, vector<16x32xf32>
    %cst_12 = arith.constant dense<0.000000e+00> : vector<16x32xf32>
    %9 = tpu.matmul %7, %8, %cst_12 {dimension_numbers = #tpu.dot_dimension_numbers<[1], [0], [0], [1], [0, 0, 1, 1], [], []>} : vector<16x16xf32>, vector<16x32xf32>, vector<16x32xf32> -> vector<16x32xf32>
    %10 = arith.addf %6, %9 : vector<16x32xf32>
    %c0_13 = arith.constant 0 : index
    %c0_14 = arith.constant 0 : index
    %11 = vector.load %arg6[%c0_13, %c0_14] : memref<1x32xf32, #tpu.memory_space<vmem>>, vector<1x32xf32>
    %12 = vector.broadcast %11 : vector<1x32xf32> to vector<16x32xf32>
    %13 = arith.addf %10, %12 : vector<16x32xf32>
    %cst_15 = arith.constant 0.000000e+00 : f32
    %14 = vector.broadcast %cst_15 : f32 to vector<16x32xf32>
    %15 = arith.cmpf oge, %13, %14 : vector<16x32xf32>
    %cst_16 = arith.constant 1.000000e-01 : f32
    %16 = vector.broadcast %cst_16 : f32 to vector<16x32xf32>
    %17 = arith.mulf %16, %13 : vector<16x32xf32>
    %18 = arith.select %15, %13, %17 : vector<16x32xi1>, vector<16x32xf32>
    %c0_17 = arith.constant 0 : index
    %c0_18 = arith.constant 0 : index
    %19 = vector.load %arg7[%c0_17, %c0_18] : memref<32x192xf32, #tpu.memory_space<vmem>>, vector<32x192xf32>
    %cst_19 = arith.constant dense<0.000000e+00> : vector<16x192xf32>
    %20 = tpu.matmul %18, %19, %cst_19 {dimension_numbers = #tpu.dot_dimension_numbers<[1], [0], [0], [1], [0, 0, 1, 1], [], []>} : vector<16x32xf32>, vector<32x192xf32>, vector<16x192xf32> -> vector<16x192xf32>
    %c0_20 = arith.constant 0 : index
    %c0_21 = arith.constant 0 : index
    %21 = vector.load %arg8[%c0_20, %c0_21] : memref<1x192xf32, #tpu.memory_space<vmem>>, vector<1x192xf32>
    %22 = vector.broadcast %21 : vector<1x192xf32> to vector<16x192xf32>
    %23 = arith.addf %20, %22 : vector<16x192xf32>
    %24 = vector.shape_cast %23 : vector<16x192xf32> to vector<2x8x192xf32>
    %25 = vector.extract_strided_slice %24 {offsets = [0, 0, 0], sizes = [2, 1, 192], strides = [1, 1, 1]} : vector<2x8x192xf32> to vector<2x1x192xf32>
    %26 = vector.shape_cast %25 : vector<2x1x192xf32> to vector<2x192xf32>
    %c0_22 = arith.constant 0 : index
    %c0_23 = arith.constant 0 : index
    %c0_24 = arith.constant 0 : index
    %27 = vector.load %arg14[%c0_22, %c0_23, %c0_24] : memref<8x2x192xf32, #tpu.memory_space<vmem>>, vector<1x2x192xf32>
    %28 = vector.shape_cast %27 : vector<1x2x192xf32> to vector<2x192xf32>
    %29 = vector.shape_cast %26 : vector<2x192xf32> to vector<1x2x192xf32>
    tpu.vector_store %arg14[%c0_22, %c0_23, %c0_24], %29 {strides = array<i32>} : memref<8x2x192xf32, #tpu.memory_space<vmem>>, vector<1x2x192xf32>,
    %30 = vector.extract_strided_slice %24 {offsets = [0, 1, 0], sizes = [2, 1, 192], strides = [1, 1, 1]} : vector<2x8x192xf32> to vector<2x1x192xf32>
    %31 = vector.shape_cast %30 : vector<2x1x192xf32> to vector<2x192xf32>
    %c1 = arith.constant 1 : index
    %c0_25 = arith.constant 0 : index
    %c0_26 = arith.constant 0 : index
    %32 = vector.load %arg14[%c1, %c0_25, %c0_26] : memref<8x2x192xf32, #tpu.memory_space<vmem>>, vector<1x2x192xf32>
    %33 = vector.shape_cast %32 : vector<1x2x192xf32> to vector<2x192xf32>
    %34 = vector.shape_cast %31 : vector<2x192xf32> to vector<1x2x192xf32>
    tpu.vector_store %arg14[%c1, %c0_25, %c0_26], %34 {strides = array<i32>} : memref<8x2x192xf32, #tpu.memory_space<vmem>>, vector<1x2x192xf32>,
    %35 = vector.extract_strided_slice %24 {offsets = [0, 2, 0], sizes = [2, 1, 192], strides = [1, 1, 1]} : vector<2x8x192xf32> to vector<2x1x192xf32>
    %36 = vector.shape_cast %35 : vector<2x1x192xf32> to vector<2x192xf32>
    %c2 = arith.constant 2 : index
    %c0_27 = arith.constant 0 : index
    %c0_28 = arith.constant 0 : index
    %37 = vector.load %arg14[%c2, %c0_27, %c0_28] : memref<8x2x192xf32, #tpu.memory_space<vmem>>, vector<1x2x192xf32>
    %38 = vector.shape_cast %37 : vector<1x2x192xf32> to vector<2x192xf32>
    %39 = vector.shape_cast %36 : vector<2x192xf32> to vector<1x2x192xf32>
    tpu.vector_store %arg14[%c2, %c0_27, %c0_28], %39 {strides = array<i32>} : memref<8x2x192xf32, #tpu.memory_space<vmem>>, vector<1x2x192xf32>,
    %40 = vector.extract_strided_slice %24 {offsets = [0, 3, 0], sizes = [2, 1, 192], strides = [1, 1, 1]} : vector<2x8x192xf32> to vector<2x1x192xf32>
    %41 = vector.shape_cast %40 : vector<2x1x192xf32> to vector<2x192xf32>
    %c3 = arith.constant 3 : index
    %c0_29 = arith.constant 0 : index
    %c0_30 = arith.constant 0 : index
    %42 = vector.load %arg14[%c3, %c0_29, %c0_30] : memref<8x2x192xf32, #tpu.memory_space<vmem>>, vector<1x2x192xf32>
    %43 = vector.shape_cast %42 : vector<1x2x192xf32> to vector<2x192xf32>
    %44 = vector.shape_cast %41 : vector<2x192xf32> to vector<1x2x192xf32>
    tpu.vector_store %arg14[%c3, %c0_29, %c0_30], %44 {strides = array<i32>} : memref<8x2x192xf32, #tpu.memory_space<vmem>>, vector<1x2x192xf32>,
    %45 = vector.extract_strided_slice %24 {offsets = [0, 4, 0], sizes = [2, 1, 192], strides = [1, 1, 1]} : vector<2x8x192xf32> to vector<2x1x192xf32>
    %46 = vector.shape_cast %45 : vector<2x1x192xf32> to vector<2x192xf32>
    %c4 = arith.constant 4 : index
    %c0_31 = arith.constant 0 : index
    %c0_32 = arith.constant 0 : index
    %47 = vector.load %arg14[%c4, %c0_31, %c0_32] : memref<8x2x192xf32, #tpu.memory_space<vmem>>, vector<1x2x192xf32>
    %48 = vector.shape_cast %47 : vector<1x2x192xf32> to vector<2x192xf32>
    %49 = vector.shape_cast %46 : vector<2x192xf32> to vector<1x2x192xf32>
    tpu.vector_store %arg14[%c4, %c0_31, %c0_32], %49 {strides = array<i32>} : memref<8x2x192xf32, #tpu.memory_space<vmem>>, vector<1x2x192xf32>,
    %50 = vector.extract_strided_slice %24 {offsets = [0, 5, 0], sizes = [2, 1, 192], strides = [1, 1, 1]} : vector<2x8x192xf32> to vector<2x1x192xf32>
    %51 = vector.shape_cast %50 : vector<2x1x192xf32> to vector<2x192xf32>
    %c5 = arith.constant 5 : index
    %c0_33 = arith.constant 0 : index
    %c0_34 = arith.constant 0 : index
    %52 = vector.load %arg14[%c5, %c0_33, %c0_34] : memref<8x2x192xf32, #tpu.memory_space<vmem>>, vector<1x2x192xf32>
    %53 = vector.shape_cast %52 : vector<1x2x192xf32> to vector<2x192xf32>
    %54 = vector.shape_cast %51 : vector<2x192xf32> to vector<1x2x192xf32>
    tpu.vector_store %arg14[%c5, %c0_33, %c0_34], %54 {strides = array<i32>} : memref<8x2x192xf32, #tpu.memory_space<vmem>>, vector<1x2x192xf32>,
    %55 = vector.extract_strided_slice %24 {offsets = [0, 6, 0], sizes = [2, 1, 192], strides = [1, 1, 1]} : vector<2x8x192xf32> to vector<2x1x192xf32>
    %56 = vector.shape_cast %55 : vector<2x1x192xf32> to vector<2x192xf32>
    %c6 = arith.constant 6 : index
    %c0_35 = arith.constant 0 : index
    %c0_36 = arith.constant 0 : index
    %57 = vector.load %arg14[%c6, %c0_35, %c0_36] : memref<8x2x192xf32, #tpu.memory_space<vmem>>, vector<1x2x192xf32>
    %58 = vector.shape_cast %57 : vector<1x2x192xf32> to vector<2x192xf32>
    %59 = vector.shape_cast %56 : vector<2x192xf32> to vector<1x2x192xf32>
    tpu.vector_store %arg14[%c6, %c0_35, %c0_36], %59 {strides = array<i32>} : memref<8x2x192xf32, #tpu.memory_space<vmem>>, vector<1x2x192xf32>,
    %60 = vector.extract_strided_slice %24 {offsets = [0, 7, 0], sizes = [2, 1, 192], strides = [1, 1, 1]} : vector<2x8x192xf32> to vector<2x1x192xf32>
    %61 = vector.shape_cast %60 : vector<2x1x192xf32> to vector<2x192xf32>
    %c7 = arith.constant 7 : index
    %c0_37 = arith.constant 0 : index
    %c0_38 = arith.constant 0 : index
    %62 = vector.load %arg14[%c7, %c0_37, %c0_38] : memref<8x2x192xf32, #tpu.memory_space<vmem>>, vector<1x2x192xf32>
    %63 = vector.shape_cast %62 : vector<1x2x192xf32> to vector<2x192xf32>
    %64 = vector.shape_cast %61 : vector<2x192xf32> to vector<1x2x192xf32>
    tpu.vector_store %arg14[%c7, %c0_37, %c0_38], %64 {strides = array<i32>} : memref<8x2x192xf32, #tpu.memory_space<vmem>>, vector<1x2x192xf32>,
    %c0_39 = arith.constant 0 : index
    %c0_40 = arith.constant 0 : index
    %65 = vector.load %arg9[%c0_39, %c0_40] : memref<64x192xf32, #tpu.memory_space<vmem>>, vector<64x192xf32>
    %c0_41 = arith.constant 0 : index
    %c0_42 = arith.constant 0 : index
    %66 = vector.load %arg10[%c0_41, %c0_42] : memref<1x64xf32, #tpu.memory_space<vmem>>, vector<1x64xf32>
    %cst_43 = arith.constant 0.000000e+00 : f32
    %67 = vector.broadcast %cst_43 : f32 to vector<2x64xf32>
    %c0_i32 = arith.constant 0 : i32
    %cst_44 = arith.constant dense<0.000000e+00> : vector<2x192xf32>
    %68 = tpu.matmul %67, %65, %cst_44 {dimension_numbers = #tpu.dot_dimension_numbers<[1], [0], [0], [1], [0, 0, 1, 1], [], []>} : vector<2x64xf32>, vector<64x192xf32>, vector<2x192xf32> -> vector<2x192xf32>
    %69 = arith.index_cast %c0_i32 : i32 to index
    %c0_45 = arith.constant 0 : index
    %c0_46 = arith.constant 0 : index
    %70 = vector.load %arg14[%69, %c0_45, %c0_46] : memref<8x2x192xf32, #tpu.memory_space<vmem>>, vector<1x2x192xf32>
    %71 = vector.shape_cast %70 : vector<1x2x192xf32> to vector<2x192xf32>
    %72 = vector.extract_strided_slice %71 {offsets = [0, 0], sizes = [2, 128], strides = [1, 1]} : vector<2x192xf32> to vector<2x128xf32>
    %73 = vector.extract_strided_slice %68 {offsets = [0, 0], sizes = [2, 128], strides = [1, 1]} : vector<2x192xf32> to vector<2x128xf32>
    %74 = arith.addf %72, %73 : vector<2x128xf32>
    %75 = arith.negf %74 : vector<2x128xf32>
    %76 = math.exp %75 : vector<2x128xf32>
    %cst_47 = arith.constant 1.000000e+00 : f32
    %77 = vector.broadcast %cst_47 : f32 to vector<2x128xf32>
    %78 = arith.addf %77, %76 : vector<2x128xf32>
    %79 = arith.divf %77, %78 : vector<2x128xf32>
    %80 = vector.extract_strided_slice %79 {offsets = [0, 0], sizes = [2, 64], strides = [1, 1]} : vector<2x128xf32> to vector<2x64xf32>
    %81 = vector.extract_strided_slice %79 {offsets = [0, 64], sizes = [2, 64], strides = [1, 1]} : vector<2x128xf32> to vector<2x64xf32>
    %82 = vector.extract_strided_slice %71 {offsets = [0, 128], sizes = [2, 64], strides = [1, 1]} : vector<2x192xf32> to vector<2x64xf32>
    %83 = vector.extract_strided_slice %68 {offsets = [0, 128], sizes = [2, 64], strides = [1, 1]} : vector<2x192xf32> to vector<2x64xf32>
    %84 = vector.broadcast %66 : vector<1x64xf32> to vector<2x64xf32>
    %85 = arith.addf %83, %84 : vector<2x64xf32>
    %86 = arith.mulf %80, %85 : vector<2x64xf32>
    %87 = arith.addf %82, %86 : vector<2x64xf32>
    %88 = math.tanh %87 : vector<2x64xf32>
    %cst_48 = arith.constant 1.000000e+00 : f32
    %89 = vector.broadcast %cst_48 : f32 to vector<2x64xf32>
    %90 = arith.subf %89, %81 : vector<2x64xf32>
    %91 = arith.mulf %90, %88 : vector<2x64xf32>
    %92 = arith.mulf %81, %67 : vector<2x64xf32>
    %93 = arith.addf %91, %92 : vector<2x64xf32>
    %94 = arith.index_cast %c0_i32 : i32 to index
    %c0_49 = arith.constant 0 : index
    %c0_50 = arith.constant 0 : index
    %95 = vector.load %arg15[%94, %c0_49, %c0_50] : memref<8x2x64xf32, #tpu.memory_space<vmem>>, vector<1x2x64xf32>
    %96 = vector.shape_cast %95 : vector<1x2x64xf32> to vector<2x64xf32>
    %97 = vector.shape_cast %93 : vector<2x64xf32> to vector<1x2x64xf32>
    tpu.vector_store %arg15[%94, %c0_49, %c0_50], %97 {strides = array<i32>} : memref<8x2x64xf32, #tpu.memory_space<vmem>>, vector<1x2x64xf32>,
    %c1_i32 = arith.constant 1 : i32
    %cst_51 = arith.constant dense<0.000000e+00> : vector<2x192xf32>
    %98 = tpu.matmul %93, %65, %cst_51 {dimension_numbers = #tpu.dot_dimension_numbers<[1], [0], [0], [1], [0, 0, 1, 1], [], []>} : vector<2x64xf32>, vector<64x192xf32>, vector<2x192xf32> -> vector<2x192xf32>
    %99 = arith.index_cast %c1_i32 : i32 to index
    %c0_52 = arith.constant 0 : index
    %c0_53 = arith.constant 0 : index
    %100 = vector.load %arg14[%99, %c0_52, %c0_53] : memref<8x2x192xf32, #tpu.memory_space<vmem>>, vector<1x2x192xf32>
    %101 = vector.shape_cast %100 : vector<1x2x192xf32> to vector<2x192xf32>
    %102 = vector.extract_strided_slice %101 {offsets = [0, 0], sizes = [2, 128], strides = [1, 1]} : vector<2x192xf32> to vector<2x128xf32>
    %103 = vector.extract_strided_slice %98 {offsets = [0, 0], sizes = [2, 128], strides = [1, 1]} : vector<2x192xf32> to vector<2x128xf32>
    %104 = arith.addf %102, %103 : vector<2x128xf32>
    %105 = arith.negf %104 : vector<2x128xf32>
    %106 = math.exp %105 : vector<2x128xf32>
    %cst_54 = arith.constant 1.000000e+00 : f32
    %107 = vector.broadcast %cst_54 : f32 to vector<2x128xf32>
    %108 = arith.addf %107, %106 : vector<2x128xf32>
    %109 = arith.divf %107, %108 : vector<2x128xf32>
    %110 = vector.extract_strided_slice %109 {offsets = [0, 0], sizes = [2, 64], strides = [1, 1]} : vector<2x128xf32> to vector<2x64xf32>
    %111 = vector.extract_strided_slice %109 {offsets = [0, 64], sizes = [2, 64], strides = [1, 1]} : vector<2x128xf32> to vector<2x64xf32>
    %112 = vector.extract_strided_slice %101 {offsets = [0, 128], sizes = [2, 64], strides = [1, 1]} : vector<2x192xf32> to vector<2x64xf32>
    %113 = vector.extract_strided_slice %98 {offsets = [0, 128], sizes = [2, 64], strides = [1, 1]} : vector<2x192xf32> to vector<2x64xf32>
    %114 = vector.broadcast %66 : vector<1x64xf32> to vector<2x64xf32>
    %115 = arith.addf %113, %114 : vector<2x64xf32>
    %116 = arith.mulf %110, %115 : vector<2x64xf32>
    %117 = arith.addf %112, %116 : vector<2x64xf32>
    %118 = math.tanh %117 : vector<2x64xf32>
    %cst_55 = arith.constant 1.000000e+00 : f32
    %119 = vector.broadcast %cst_55 : f32 to vector<2x64xf32>
    %120 = arith.subf %119, %111 : vector<2x64xf32>
    %121 = arith.mulf %120, %118 : vector<2x64xf32>
    %122 = arith.mulf %111, %93 : vector<2x64xf32>
    %123 = arith.addf %121, %122 : vector<2x64xf32>
    %124 = arith.index_cast %c1_i32 : i32 to index
    %c0_56 = arith.constant 0 : index
    %c0_57 = arith.constant 0 : index
    %125 = vector.load %arg15[%124, %c0_56, %c0_57] : memref<8x2x64xf32, #tpu.memory_space<vmem>>, vector<1x2x64xf32>
    %126 = vector.shape_cast %125 : vector<1x2x64xf32> to vector<2x64xf32>
    %127 = vector.shape_cast %123 : vector<2x64xf32> to vector<1x2x64xf32>
    tpu.vector_store %arg15[%124, %c0_56, %c0_57], %127 {strides = array<i32>} : memref<8x2x64xf32, #tpu.memory_space<vmem>>, vector<1x2x64xf32>,
    %c2_i32 = arith.constant 2 : i32
    %cst_58 = arith.constant dense<0.000000e+00> : vector<2x192xf32>
    %128 = tpu.matmul %123, %65, %cst_58 {dimension_numbers = #tpu.dot_dimension_numbers<[1], [0], [0], [1], [0, 0, 1, 1], [], []>} : vector<2x64xf32>, vector<64x192xf32>, vector<2x192xf32> -> vector<2x192xf32>
    %129 = arith.index_cast %c2_i32 : i32 to index
    %c0_59 = arith.constant 0 : index
    %c0_60 = arith.constant 0 : index
    %130 = vector.load %arg14[%129, %c0_59, %c0_60] : memref<8x2x192xf32, #tpu.memory_space<vmem>>, vector<1x2x192xf32>
    %131 = vector.shape_cast %130 : vector<1x2x192xf32> to vector<2x192xf32>
    %132 = vector.extract_strided_slice %131 {offsets = [0, 0], sizes = [2, 128], strides = [1, 1]} : vector<2x192xf32> to vector<2x128xf32>
    %133 = vector.extract_strided_slice %128 {offsets = [0, 0], sizes = [2, 128], strides = [1, 1]} : vector<2x192xf32> to vector<2x128xf32>
    %134 = arith.addf %132, %133 : vector<2x128xf32>
    %135 = arith.negf %134 : vector<2x128xf32>
    %136 = math.exp %135 : vector<2x128xf32>
    %cst_61 = arith.constant 1.000000e+00 : f32
    %137 = vector.broadcast %cst_61 : f32 to vector<2x128xf32>
    %138 = arith.addf %137, %136 : vector<2x128xf32>
    %139 = arith.divf %137, %138 : vector<2x128xf32>
    %140 = vector.extract_strided_slice %139 {offsets = [0, 0], sizes = [2, 64], strides = [1, 1]} : vector<2x128xf32> to vector<2x64xf32>
    %141 = vector.extract_strided_slice %139 {offsets = [0, 64], sizes = [2, 64], strides = [1, 1]} : vector<2x128xf32> to vector<2x64xf32>
    %142 = vector.extract_strided_slice %131 {offsets = [0, 128], sizes = [2, 64], strides = [1, 1]} : vector<2x192xf32> to vector<2x64xf32>
    %143 = vector.extract_strided_slice %128 {offsets = [0, 128], sizes = [2, 64], strides = [1, 1]} : vector<2x192xf32> to vector<2x64xf32>
    %144 = vector.broadcast %66 : vector<1x64xf32> to vector<2x64xf32>
    %145 = arith.addf %143, %144 : vector<2x64xf32>
    %146 = arith.mulf %140, %145 : vector<2x64xf32>
    %147 = arith.addf %142, %146 : vector<2x64xf32>
    %148 = math.tanh %147 : vector<2x64xf32>
    %cst_62 = arith.constant 1.000000e+00 : f32
    %149 = vector.broadcast %cst_62 : f32 to vector<2x64xf32>
    %150 = arith.subf %149, %141 : vector<2x64xf32>
    %151 = arith.mulf %150, %148 : vector<2x64xf32>
    %152 = arith.mulf %141, %123 : vector<2x64xf32>
    %153 = arith.addf %151, %152 : vector<2x64xf32>
    %154 = arith.index_cast %c2_i32 : i32 to index
    %c0_63 = arith.constant 0 : index
    %c0_64 = arith.constant 0 : index
    %155 = vector.load %arg15[%154, %c0_63, %c0_64] : memref<8x2x64xf32, #tpu.memory_space<vmem>>, vector<1x2x64xf32>
    %156 = vector.shape_cast %155 : vector<1x2x64xf32> to vector<2x64xf32>
    %157 = vector.shape_cast %153 : vector<2x64xf32> to vector<1x2x64xf32>
    tpu.vector_store %arg15[%154, %c0_63, %c0_64], %157 {strides = array<i32>} : memref<8x2x64xf32, #tpu.memory_space<vmem>>, vector<1x2x64xf32>,
    %c3_i32 = arith.constant 3 : i32
    %cst_65 = arith.constant dense<0.000000e+00> : vector<2x192xf32>
    %158 = tpu.matmul %153, %65, %cst_65 {dimension_numbers = #tpu.dot_dimension_numbers<[1], [0], [0], [1], [0, 0, 1, 1], [], []>} : vector<2x64xf32>, vector<64x192xf32>, vector<2x192xf32> -> vector<2x192xf32>
    %159 = arith.index_cast %c3_i32 : i32 to index
    %c0_66 = arith.constant 0 : index
    %c0_67 = arith.constant 0 : index
    %160 = vector.load %arg14[%159, %c0_66, %c0_67] : memref<8x2x192xf32, #tpu.memory_space<vmem>>, vector<1x2x192xf32>
    %161 = vector.shape_cast %160 : vector<1x2x192xf32> to vector<2x192xf32>
    %162 = vector.extract_strided_slice %161 {offsets = [0, 0], sizes = [2, 128], strides = [1, 1]} : vector<2x192xf32> to vector<2x128xf32>
    %163 = vector.extract_strided_slice %158 {offsets = [0, 0], sizes = [2, 128], strides = [1, 1]} : vector<2x192xf32> to vector<2x128xf32>
    %164 = arith.addf %162, %163 : vector<2x128xf32>
    %165 = arith.negf %164 : vector<2x128xf32>
    %166 = math.exp %165 : vector<2x128xf32>
    %cst_68 = arith.constant 1.000000e+00 : f32
    %167 = vector.broadcast %cst_68 : f32 to vector<2x128xf32>
    %168 = arith.addf %167, %166 : vector<2x128xf32>
    %169 = arith.divf %167, %168 : vector<2x128xf32>
    %170 = vector.extract_strided_slice %169 {offsets = [0, 0], sizes = [2, 64], strides = [1, 1]} : vector<2x128xf32> to vector<2x64xf32>
    %171 = vector.extract_strided_slice %169 {offsets = [0, 64], sizes = [2, 64], strides = [1, 1]} : vector<2x128xf32> to vector<2x64xf32>
    %172 = vector.extract_strided_slice %161 {offsets = [0, 128], sizes = [2, 64], strides = [1, 1]} : vector<2x192xf32> to vector<2x64xf32>
    %173 = vector.extract_strided_slice %158 {offsets = [0, 128], sizes = [2, 64], strides = [1, 1]} : vector<2x192xf32> to vector<2x64xf32>
    %174 = vector.broadcast %66 : vector<1x64xf32> to vector<2x64xf32>
    %175 = arith.addf %173, %174 : vector<2x64xf32>
    %176 = arith.mulf %170, %175 : vector<2x64xf32>
    %177 = arith.addf %172, %176 : vector<2x64xf32>
    %178 = math.tanh %177 : vector<2x64xf32>
    %cst_69 = arith.constant 1.000000e+00 : f32
    %179 = vector.broadcast %cst_69 : f32 to vector<2x64xf32>
    %180 = arith.subf %179, %171 : vector<2x64xf32>
    %181 = arith.mulf %180, %178 : vector<2x64xf32>
    %182 = arith.mulf %171, %153 : vector<2x64xf32>
    %183 = arith.addf %181, %182 : vector<2x64xf32>
    %184 = arith.index_cast %c3_i32 : i32 to index
    %c0_70 = arith.constant 0 : index
    %c0_71 = arith.constant 0 : index
    %185 = vector.load %arg15[%184, %c0_70, %c0_71] : memref<8x2x64xf32, #tpu.memory_space<vmem>>, vector<1x2x64xf32>
    %186 = vector.shape_cast %185 : vector<1x2x64xf32> to vector<2x64xf32>
    %187 = vector.shape_cast %183 : vector<2x64xf32> to vector<1x2x64xf32>
    tpu.vector_store %arg15[%184, %c0_70, %c0_71], %187 {strides = array<i32>} : memref<8x2x64xf32, #tpu.memory_space<vmem>>, vector<1x2x64xf32>,
    %c4_i32 = arith.constant 4 : i32
    %cst_72 = arith.constant dense<0.000000e+00> : vector<2x192xf32>
    %188 = tpu.matmul %183, %65, %cst_72 {dimension_numbers = #tpu.dot_dimension_numbers<[1], [0], [0], [1], [0, 0, 1, 1], [], []>} : vector<2x64xf32>, vector<64x192xf32>, vector<2x192xf32> -> vector<2x192xf32>
    %189 = arith.index_cast %c4_i32 : i32 to index
    %c0_73 = arith.constant 0 : index
    %c0_74 = arith.constant 0 : index
    %190 = vector.load %arg14[%189, %c0_73, %c0_74] : memref<8x2x192xf32, #tpu.memory_space<vmem>>, vector<1x2x192xf32>
    %191 = vector.shape_cast %190 : vector<1x2x192xf32> to vector<2x192xf32>
    %192 = vector.extract_strided_slice %191 {offsets = [0, 0], sizes = [2, 128], strides = [1, 1]} : vector<2x192xf32> to vector<2x128xf32>
    %193 = vector.extract_strided_slice %188 {offsets = [0, 0], sizes = [2, 128], strides = [1, 1]} : vector<2x192xf32> to vector<2x128xf32>
    %194 = arith.addf %192, %193 : vector<2x128xf32>
    %195 = arith.negf %194 : vector<2x128xf32>
    %196 = math.exp %195 : vector<2x128xf32>
    %cst_75 = arith.constant 1.000000e+00 : f32
    %197 = vector.broadcast %cst_75 : f32 to vector<2x128xf32>
    %198 = arith.addf %197, %196 : vector<2x128xf32>
    %199 = arith.divf %197, %198 : vector<2x128xf32>
    %200 = vector.extract_strided_slice %199 {offsets = [0, 0], sizes = [2, 64], strides = [1, 1]} : vector<2x128xf32> to vector<2x64xf32>
    %201 = vector.extract_strided_slice %199 {offsets = [0, 64], sizes = [2, 64], strides = [1, 1]} : vector<2x128xf32> to vector<2x64xf32>
    %202 = vector.extract_strided_slice %191 {offsets = [0, 128], sizes = [2, 64], strides = [1, 1]} : vector<2x192xf32> to vector<2x64xf32>
    %203 = vector.extract_strided_slice %188 {offsets = [0, 128], sizes = [2, 64], strides = [1, 1]} : vector<2x192xf32> to vector<2x64xf32>
    %204 = vector.broadcast %66 : vector<1x64xf32> to vector<2x64xf32>
    %205 = arith.addf %203, %204 : vector<2x64xf32>
    %206 = arith.mulf %200, %205 : vector<2x64xf32>
    %207 = arith.addf %202, %206 : vector<2x64xf32>
    %208 = math.tanh %207 : vector<2x64xf32>
    %cst_76 = arith.constant 1.000000e+00 : f32
    %209 = vector.broadcast %cst_76 : f32 to vector<2x64xf32>
    %210 = arith.subf %209, %201 : vector<2x64xf32>
    %211 = arith.mulf %210, %208 : vector<2x64xf32>
    %212 = arith.mulf %201, %183 : vector<2x64xf32>
    %213 = arith.addf %211, %212 : vector<2x64xf32>
    %214 = arith.index_cast %c4_i32 : i32 to index
    %c0_77 = arith.constant 0 : index
    %c0_78 = arith.constant 0 : index
    %215 = vector.load %arg15[%214, %c0_77, %c0_78] : memref<8x2x64xf32, #tpu.memory_space<vmem>>, vector<1x2x64xf32>
    %216 = vector.shape_cast %215 : vector<1x2x64xf32> to vector<2x64xf32>
    %217 = vector.shape_cast %213 : vector<2x64xf32> to vector<1x2x64xf32>
    tpu.vector_store %arg15[%214, %c0_77, %c0_78], %217 {strides = array<i32>} : memref<8x2x64xf32, #tpu.memory_space<vmem>>, vector<1x2x64xf32>,
    %c5_i32 = arith.constant 5 : i32
    %cst_79 = arith.constant dense<0.000000e+00> : vector<2x192xf32>
    %218 = tpu.matmul %213, %65, %cst_79 {dimension_numbers = #tpu.dot_dimension_numbers<[1], [0], [0], [1], [0, 0, 1, 1], [], []>} : vector<2x64xf32>, vector<64x192xf32>, vector<2x192xf32> -> vector<2x192xf32>
    %219 = arith.index_cast %c5_i32 : i32 to index
    %c0_80 = arith.constant 0 : index
    %c0_81 = arith.constant 0 : index
    %220 = vector.load %arg14[%219, %c0_80, %c0_81] : memref<8x2x192xf32, #tpu.memory_space<vmem>>, vector<1x2x192xf32>
    %221 = vector.shape_cast %220 : vector<1x2x192xf32> to vector<2x192xf32>
    %222 = vector.extract_strided_slice %221 {offsets = [0, 0], sizes = [2, 128], strides = [1, 1]} : vector<2x192xf32> to vector<2x128xf32>
    %223 = vector.extract_strided_slice %218 {offsets = [0, 0], sizes = [2, 128], strides = [1, 1]} : vector<2x192xf32> to vector<2x128xf32>
    %224 = arith.addf %222, %223 : vector<2x128xf32>
    %225 = arith.negf %224 : vector<2x128xf32>
    %226 = math.exp %225 : vector<2x128xf32>
    %cst_82 = arith.constant 1.000000e+00 : f32
    %227 = vector.broadcast %cst_82 : f32 to vector<2x128xf32>
    %228 = arith.addf %227, %226 : vector<2x128xf32>
    %229 = arith.divf %227, %228 : vector<2x128xf32>
    %230 = vector.extract_strided_slice %229 {offsets = [0, 0], sizes = [2, 64], strides = [1, 1]} : vector<2x128xf32> to vector<2x64xf32>
    %231 = vector.extract_strided_slice %229 {offsets = [0, 64], sizes = [2, 64], strides = [1, 1]} : vector<2x128xf32> to vector<2x64xf32>
    %232 = vector.extract_strided_slice %221 {offsets = [0, 128], sizes = [2, 64], strides = [1, 1]} : vector<2x192xf32> to vector<2x64xf32>
    %233 = vector.extract_strided_slice %218 {offsets = [0, 128], sizes = [2, 64], strides = [1, 1]} : vector<2x192xf32> to vector<2x64xf32>
    %234 = vector.broadcast %66 : vector<1x64xf32> to vector<2x64xf32>
    %235 = arith.addf %233, %234 : vector<2x64xf32>
    %236 = arith.mulf %230, %235 : vector<2x64xf32>
    %237 = arith.addf %232, %236 : vector<2x64xf32>
    %238 = math.tanh %237 : vector<2x64xf32>
    %cst_83 = arith.constant 1.000000e+00 : f32
    %239 = vector.broadcast %cst_83 : f32 to vector<2x64xf32>
    %240 = arith.subf %239, %231 : vector<2x64xf32>
    %241 = arith.mulf %240, %238 : vector<2x64xf32>
    %242 = arith.mulf %231, %213 : vector<2x64xf32>
    %243 = arith.addf %241, %242 : vector<2x64xf32>
    %244 = arith.index_cast %c5_i32 : i32 to index
    %c0_84 = arith.constant 0 : index
    %c0_85 = arith.constant 0 : index
    %245 = vector.load %arg15[%244, %c0_84, %c0_85] : memref<8x2x64xf32, #tpu.memory_space<vmem>>, vector<1x2x64xf32>
    %246 = vector.shape_cast %245 : vector<1x2x64xf32> to vector<2x64xf32>
    %247 = vector.shape_cast %243 : vector<2x64xf32> to vector<1x2x64xf32>
    tpu.vector_store %arg15[%244, %c0_84, %c0_85], %247 {strides = array<i32>} : memref<8x2x64xf32, #tpu.memory_space<vmem>>, vector<1x2x64xf32>,
    %c6_i32 = arith.constant 6 : i32
    %cst_86 = arith.constant dense<0.000000e+00> : vector<2x192xf32>
    %248 = tpu.matmul %243, %65, %cst_86 {dimension_numbers = #tpu.dot_dimension_numbers<[1], [0], [0], [1], [0, 0, 1, 1], [], []>} : vector<2x64xf32>, vector<64x192xf32>, vector<2x192xf32> -> vector<2x192xf32>
    %249 = arith.index_cast %c6_i32 : i32 to index
    %c0_87 = arith.constant 0 : index
    %c0_88 = arith.constant 0 : index
    %250 = vector.load %arg14[%249, %c0_87, %c0_88] : memref<8x2x192xf32, #tpu.memory_space<vmem>>, vector<1x2x192xf32>
    %251 = vector.shape_cast %250 : vector<1x2x192xf32> to vector<2x192xf32>
    %252 = vector.extract_strided_slice %251 {offsets = [0, 0], sizes = [2, 128], strides = [1, 1]} : vector<2x192xf32> to vector<2x128xf32>
    %253 = vector.extract_strided_slice %248 {offsets = [0, 0], sizes = [2, 128], strides = [1, 1]} : vector<2x192xf32> to vector<2x128xf32>
    %254 = arith.addf %252, %253 : vector<2x128xf32>
    %255 = arith.negf %254 : vector<2x128xf32>
    %256 = math.exp %255 : vector<2x128xf32>
    %cst_89 = arith.constant 1.000000e+00 : f32
    %257 = vector.broadcast %cst_89 : f32 to vector<2x128xf32>
    %258 = arith.addf %257, %256 : vector<2x128xf32>
    %259 = arith.divf %257, %258 : vector<2x128xf32>
    %260 = vector.extract_strided_slice %259 {offsets = [0, 0], sizes = [2, 64], strides = [1, 1]} : vector<2x128xf32> to vector<2x64xf32>
    %261 = vector.extract_strided_slice %259 {offsets = [0, 64], sizes = [2, 64], strides = [1, 1]} : vector<2x128xf32> to vector<2x64xf32>
    %262 = vector.extract_strided_slice %251 {offsets = [0, 128], sizes = [2, 64], strides = [1, 1]} : vector<2x192xf32> to vector<2x64xf32>
    %263 = vector.extract_strided_slice %248 {offsets = [0, 128], sizes = [2, 64], strides = [1, 1]} : vector<2x192xf32> to vector<2x64xf32>
    %264 = vector.broadcast %66 : vector<1x64xf32> to vector<2x64xf32>
    %265 = arith.addf %263, %264 : vector<2x64xf32>
    %266 = arith.mulf %260, %265 : vector<2x64xf32>
    %267 = arith.addf %262, %266 : vector<2x64xf32>
    %268 = math.tanh %267 : vector<2x64xf32>
    %cst_90 = arith.constant 1.000000e+00 : f32
    %269 = vector.broadcast %cst_90 : f32 to vector<2x64xf32>
    %270 = arith.subf %269, %261 : vector<2x64xf32>
    %271 = arith.mulf %270, %268 : vector<2x64xf32>
    %272 = arith.mulf %261, %243 : vector<2x64xf32>
    %273 = arith.addf %271, %272 : vector<2x64xf32>
    %274 = arith.index_cast %c6_i32 : i32 to index
    %c0_91 = arith.constant 0 : index
    %c0_92 = arith.constant 0 : index
    %275 = vector.load %arg15[%274, %c0_91, %c0_92] : memref<8x2x64xf32, #tpu.memory_space<vmem>>, vector<1x2x64xf32>
    %276 = vector.shape_cast %275 : vector<1x2x64xf32> to vector<2x64xf32>
    %277 = vector.shape_cast %273 : vector<2x64xf32> to vector<1x2x64xf32>
    tpu.vector_store %arg15[%274, %c0_91, %c0_92], %277 {strides = array<i32>} : memref<8x2x64xf32, #tpu.memory_space<vmem>>, vector<1x2x64xf32>,
    %c7_i32 = arith.constant 7 : i32
    %cst_93 = arith.constant dense<0.000000e+00> : vector<2x192xf32>
    %278 = tpu.matmul %273, %65, %cst_93 {dimension_numbers = #tpu.dot_dimension_numbers<[1], [0], [0], [1], [0, 0, 1, 1], [], []>} : vector<2x64xf32>, vector<64x192xf32>, vector<2x192xf32> -> vector<2x192xf32>
    %279 = arith.index_cast %c7_i32 : i32 to index
    %c0_94 = arith.constant 0 : index
    %c0_95 = arith.constant 0 : index
    %280 = vector.load %arg14[%279, %c0_94, %c0_95] : memref<8x2x192xf32, #tpu.memory_space<vmem>>, vector<1x2x192xf32>
    %281 = vector.shape_cast %280 : vector<1x2x192xf32> to vector<2x192xf32>
    %282 = vector.extract_strided_slice %281 {offsets = [0, 0], sizes = [2, 128], strides = [1, 1]} : vector<2x192xf32> to vector<2x128xf32>
    %283 = vector.extract_strided_slice %278 {offsets = [0, 0], sizes = [2, 128], strides = [1, 1]} : vector<2x192xf32> to vector<2x128xf32>
    %284 = arith.addf %282, %283 : vector<2x128xf32>
    %285 = arith.negf %284 : vector<2x128xf32>
    %286 = math.exp %285 : vector<2x128xf32>
    %cst_96 = arith.constant 1.000000e+00 : f32
    %287 = vector.broadcast %cst_96 : f32 to vector<2x128xf32>
    %288 = arith.addf %287, %286 : vector<2x128xf32>
    %289 = arith.divf %287, %288 : vector<2x128xf32>
    %290 = vector.extract_strided_slice %289 {offsets = [0, 0], sizes = [2, 64], strides = [1, 1]} : vector<2x128xf32> to vector<2x64xf32>
    %291 = vector.extract_strided_slice %289 {offsets = [0, 64], sizes = [2, 64], strides = [1, 1]} : vector<2x128xf32> to vector<2x64xf32>
    %292 = vector.extract_strided_slice %281 {offsets = [0, 128], sizes = [2, 64], strides = [1, 1]} : vector<2x192xf32> to vector<2x64xf32>
    %293 = vector.extract_strided_slice %278 {offsets = [0, 128], sizes = [2, 64], strides = [1, 1]} : vector<2x192xf32> to vector<2x64xf32>
    %294 = vector.broadcast %66 : vector<1x64xf32> to vector<2x64xf32>
    %295 = arith.addf %293, %294 : vector<2x64xf32>
    %296 = arith.mulf %290, %295 : vector<2x64xf32>
    %297 = arith.addf %292, %296 : vector<2x64xf32>
    %298 = math.tanh %297 : vector<2x64xf32>
    %cst_97 = arith.constant 1.000000e+00 : f32
    %299 = vector.broadcast %cst_97 : f32 to vector<2x64xf32>
    %300 = arith.subf %299, %291 : vector<2x64xf32>
    %301 = arith.mulf %300, %298 : vector<2x64xf32>
    %302 = arith.mulf %291, %273 : vector<2x64xf32>
    %303 = arith.addf %301, %302 : vector<2x64xf32>
    %304 = arith.index_cast %c7_i32 : i32 to index
    %c0_98 = arith.constant 0 : index
    %c0_99 = arith.constant 0 : index
    %305 = vector.load %arg15[%304, %c0_98, %c0_99] : memref<8x2x64xf32, #tpu.memory_space<vmem>>, vector<1x2x64xf32>
    %306 = vector.shape_cast %305 : vector<1x2x64xf32> to vector<2x64xf32>
    %307 = vector.shape_cast %303 : vector<2x64xf32> to vector<1x2x64xf32>
    tpu.vector_store %arg15[%304, %c0_98, %c0_99], %307 {strides = array<i32>} : memref<8x2x64xf32, #tpu.memory_space<vmem>>, vector<1x2x64xf32>,
    %c8_i32 = arith.constant 8 : i32
    %c0_100 = arith.constant 0 : index
    %c0_101 = arith.constant 0 : index
    %c0_102 = arith.constant 0 : index
    %308 = vector.load %arg15[%c0_100, %c0_101, %c0_102] : memref<8x2x64xf32, #tpu.memory_space<vmem>>, vector<8x2x64xf32>
    %c0_103 = arith.constant 0 : index
    %c0_104 = arith.constant 0 : index
    %309 = vector.load %arg11[%c0_103, %c0_104] : memref<64x32xf32, #tpu.memory_space<vmem>>, vector<64x32xf32>
    %c0_105 = arith.constant 0 : index
    %c0_106 = arith.constant 0 : index
    %310 = vector.load %arg12[%c0_105, %c0_106] : memref<1x32xf32, #tpu.memory_space<vmem>>, vector<1x32xf32>
    %311 = vector.extract_strided_slice %308 {offsets = [0, 0, 0], sizes = [8, 1, 64], strides = [1, 1, 1]} : vector<8x2x64xf32> to vector<8x1x64xf32>
    %312 = vector.shape_cast %311 : vector<8x1x64xf32> to vector<8x64xf32>
    %cst_107 = arith.constant dense<0.000000e+00> : vector<8xf32>
    %313 = vector.multi_reduction <add>, %312, %cst_107 [1] : vector<8x64xf32> to vector<8xf32>
    %314 = vector.shape_cast %313 : vector<8xf32> to vector<8x1xf32>
    %cst_108 = arith.constant 6.400000e+01 : f32
    %315 = vector.broadcast %cst_108 : f32 to vector<8x1xf32>
    %316 = arith.divf %314, %315 : vector<8x1xf32>
    %317 = vector.broadcast %316 : vector<8x1xf32> to vector<8x64xf32>
    %318 = arith.subf %312, %317 : vector<8x64xf32>
    %319 = arith.mulf %318, %318 : vector<8x64xf32>
    %cst_109 = arith.constant dense<0.000000e+00> : vector<8xf32>
    %320 = vector.multi_reduction <add>, %319, %cst_109 [1] : vector<8x64xf32> to vector<8xf32>
    %321 = vector.shape_cast %320 : vector<8xf32> to vector<8x1xf32>
    %cst_110 = arith.constant 6.400000e+01 : f32
    %322 = vector.broadcast %cst_110 : f32 to vector<8x1xf32>
    %323 = arith.divf %321, %322 : vector<8x1xf32>
    %324 = vector.broadcast %316 : vector<8x1xf32> to vector<8x64xf32>
    %325 = arith.subf %312, %324 : vector<8x64xf32>
    %cst_111 = arith.constant 9.99999974E-6 : f32
    %326 = vector.broadcast %cst_111 : f32 to vector<8x1xf32>
    %327 = arith.addf %323, %326 : vector<8x1xf32>
    %328 = math.rsqrt %327 : vector<8x1xf32>
    %329 = vector.broadcast %328 : vector<8x1xf32> to vector<8x64xf32>
    %330 = arith.mulf %325, %329 : vector<8x64xf32>
    %cst_112 = arith.constant dense<0.000000e+00> : vector<8x32xf32>
    %331 = tpu.matmul %330, %309, %cst_112 {dimension_numbers = #tpu.dot_dimension_numbers<[1], [0], [0], [1], [0, 0, 1, 1], [], []>} : vector<8x64xf32>, vector<64x32xf32>, vector<8x32xf32> -> vector<8x32xf32>
    %332 = vector.broadcast %310 : vector<1x32xf32> to vector<8x32xf32>
    %333 = arith.addf %331, %332 : vector<8x32xf32>
    %c0_113 = arith.constant 0 : index
    %c0_114 = arith.constant 0 : index
    %c0_115 = arith.constant 0 : index
    %334 = vector.load %arg13[%c0_113, %c0_114, %c0_115] : memref<2x8x32xf32, #tpu.memory_space<vmem>>, vector<1x8x32xf32>
    %335 = vector.shape_cast %334 : vector<1x8x32xf32> to vector<8x32xf32>
    %336 = vector.shape_cast %333 : vector<8x32xf32> to vector<1x8x32xf32>
    tpu.vector_store %arg13[%c0_113, %c0_114, %c0_115], %336 {strides = array<i32>} : memref<2x8x32xf32, #tpu.memory_space<vmem>>, vector<1x8x32xf32>,
    %337 = vector.extract_strided_slice %308 {offsets = [0, 1, 0], sizes = [8, 1, 64], strides = [1, 1, 1]} : vector<8x2x64xf32> to vector<8x1x64xf32>
    %338 = vector.shape_cast %337 : vector<8x1x64xf32> to vector<8x64xf32>
    %cst_116 = arith.constant dense<0.000000e+00> : vector<8xf32>
    %339 = vector.multi_reduction <add>, %338, %cst_116 [1] : vector<8x64xf32> to vector<8xf32>
    %340 = vector.shape_cast %339 : vector<8xf32> to vector<8x1xf32>
    %cst_117 = arith.constant 6.400000e+01 : f32
    %341 = vector.broadcast %cst_117 : f32 to vector<8x1xf32>
    %342 = arith.divf %340, %341 : vector<8x1xf32>
    %343 = vector.broadcast %342 : vector<8x1xf32> to vector<8x64xf32>
    %344 = arith.subf %338, %343 : vector<8x64xf32>
    %345 = arith.mulf %344, %344 : vector<8x64xf32>
    %cst_118 = arith.constant dense<0.000000e+00> : vector<8xf32>
    %346 = vector.multi_reduction <add>, %345, %cst_118 [1] : vector<8x64xf32> to vector<8xf32>
    %347 = vector.shape_cast %346 : vector<8xf32> to vector<8x1xf32>
    %cst_119 = arith.constant 6.400000e+01 : f32
    %348 = vector.broadcast %cst_119 : f32 to vector<8x1xf32>
    %349 = arith.divf %347, %348 : vector<8x1xf32>
    %350 = vector.broadcast %342 : vector<8x1xf32> to vector<8x64xf32>
    %351 = arith.subf %338, %350 : vector<8x64xf32>
    %cst_120 = arith.constant 9.99999974E-6 : f32
    %352 = vector.broadcast %cst_120 : f32 to vector<8x1xf32>
    %353 = arith.addf %349, %352 : vector<8x1xf32>
    %354 = math.rsqrt %353 : vector<8x1xf32>
    %355 = vector.broadcast %354 : vector<8x1xf32> to vector<8x64xf32>
    %356 = arith.mulf %351, %355 : vector<8x64xf32>
    %cst_121 = arith.constant dense<0.000000e+00> : vector<8x32xf32>
    %357 = tpu.matmul %356, %309, %cst_121 {dimension_numbers = #tpu.dot_dimension_numbers<[1], [0], [0], [1], [0, 0, 1, 1], [], []>} : vector<8x64xf32>, vector<64x32xf32>, vector<8x32xf32> -> vector<8x32xf32>
    %358 = vector.broadcast %310 : vector<1x32xf32> to vector<8x32xf32>
    %359 = arith.addf %357, %358 : vector<8x32xf32>
    %c1_122 = arith.constant 1 : index
    %c0_123 = arith.constant 0 : index
    %c0_124 = arith.constant 0 : index
    %360 = vector.load %arg13[%c1_122, %c0_123, %c0_124] : memref<2x8x32xf32, #tpu.memory_space<vmem>>, vector<1x8x32xf32>
    %361 = vector.shape_cast %360 : vector<1x8x32xf32> to vector<8x32xf32>
    %362 = vector.shape_cast %359 : vector<8x32xf32> to vector<1x8x32xf32>
    tpu.vector_store %arg13[%c1_122, %c0_123, %c0_124], %362 {strides = array<i32>} : memref<2x8x32xf32, #tpu.memory_space<vmem>>, vector<1x8x32xf32>,
    return
  }
}

</mosaic_0001>

<bundles_post_ra>
// kernel: tpu_custom_call.1
= control target key start
LH: loop header
LB: loop body
LE: loop exit
PB: predicated region body
PF: predicated region fallthrough
CT: control target
= control target key end

     0   :  { %18 = vsyncpa [#allocation5], 0  ;;  %s3063_s0 = inlined_call_operand.hbm [shape: f32[16,32], index: 0, kind: input, shape index: {}]   ;;  %s3064_s1 = inlined_call_operand.vmem [shape: f32[16,4], index: 1, kind: input, shape index: {}]   ;;  %s3065_s2 = inlined_call_operand.hbm [shape: f32[16,16], index: 2, kind: input, shape index: {}]   ;;  %s3066_s3 = inlined_call_operand.hbm [shape: f32[32,32], index: 3, kind: input, shape index: {}]   ;;  %s3067_s4 = inlined_call_operand.vmem [shape: f32[4,32], index: 4, kind: input, shape index: {}]   ;;  %s3068_s5 = inlined_call_operand.hbm [shape: f32[16,32], index: 5, kind: input, shape index: {}]   ;;  %s3069_s6 = inlined_call_operand.hbm [shape: f32[1,32], index: 6, kind: input, shape index: {}]   ;;  %s3070_s7 = inlined_call_operand.hbm [shape: f32[32,192], index: 7, kind: input, shape index: {}]   ;;  %s3071_s8 = inlined_call_operand.hbm [shape: f32[1,192], index: 8, kind: input, shape index: {}]   ;;  %s3072_s9 = inlined_call_operand.vmem [shape: f32[64,192], index: 9, kind: input, shape index: {}]   ;;  %s3073_s10 = inlined_call_operand.vmem [shape: f32[1,64], index: 10, kind: input, shape index: {}]   ;;  %s3074_s11 = inlined_call_operand.vmem [shape: f32[64,32], index: 11, kind: input, shape index: {}]   ;;  %s3075_s12 = inlined_call_operand.vmem [shape: f32[1,32], index: 12, kind: input, shape index: {}]   ;;  %s3076_s13 = inlined_call_operand.hbm [shape: f32[2,8,32], index: 13, kind: output, shape index: {}]  }
   0x1   :  { %19 = vsyncpa [#allocation8], 0 }
   0x2   :  { %20 = vsyncpa [#allocation11], 0 }
   0x3   :  { %21 = vsyncpa [#allocation14], 0 }
   0x4   :  { %22 = vsyncpa [#allocation6], 0  ;;  %s2364_s25 = smov [#allocation7]   ;;  %s2365_s27 = smov [#allocation10]  }
   0x5   :  { %s42_s26 = sshll.u32 %s2364_s25, 4  ;;  %s68_s28 = sshll.u32 %s2365_s27, 4  ;;  %s43_s26 = int_to_ptr.vmem [resolvable:$true] %s42_s26  ;;  %s69_s28 = int_to_ptr.vmem [resolvable:$true] %s68_s28 }
   0x6   :  { %s2202_s29 = scalar_lea.vmem %s43_s26, 256  ;;  %p2207_p1 = scmp.lt.s32.totalorder %s43_s26, %s43_s26 }
   0x7   :  { %p2203_p0 = scmp.ne.s32.totalorder %s43_s26, %s2202_s29  ;;  %p2208_p2 = scmp.lt.s32.totalorder %s2202_s29, %s2202_s29 }
   0x9   :  { %p2209_p3 = por %p2208_p2, %p2207_p1 }
   0xb   :  { %p2210_p4 = pnand %p2209_p3, %p2203_p0 }
   0xd   :  { %2213 = shalt.err (!%p2210_p4)
}
   0xe   :  { %s2366_s30 = smov 128   ;;  %s2367_s14 = smov 8  }
   0xf   :  { %48 = dma.hbm_to_vmem [thread:$0]  %s3065_s2, 256, %s43_s26, [#allocation8], %s2366_s30, %s2366_s30, %s2367_s14  }
  0x10   :  { %s2222_s17 = scalar_lea.vmem %s69_s28, 256  ;;  %p2227_p6 = scmp.lt.s32.totalorder %s69_s28, %s69_s28 }
  0x11   :  { %p2223_p5 = scmp.ne.s32.totalorder %s69_s28, %s2222_s17  ;;  %p2228_p7 = scmp.lt.s32.totalorder %s2222_s17, %s2222_s17 }
  0x13   :  { %p2229_p8 = por %p2228_p7, %p2227_p6 }
  0x15   :  { %p2230_p9 = pnand %p2229_p8, %p2223_p5 }
  0x17   :  { %2233 = shalt.err (!%p2230_p9)
}
  0x18   :  { %74 = dma.hbm_to_vmem [thread:$0]  %s3068_s5, 256, %s69_s28, [#allocation11], %s2366_s30, %s2366_s30, %s2367_s14  }
  0x19   :  { %s2368_s20 = smov [#allocation13]  }
  0x1a   :  { %s90_s21 = sshll.u32 %s2368_s20, 4  ;;  %s91_s21 = int_to_ptr.vmem [resolvable:$true] %s90_s21 }
  0x1b   :  { %s2242_s22 = scalar_lea.vmem %s91_s21, 1024  ;;  %p2247_p11 = scmp.lt.s32.totalorder %s91_s21, %s91_s21 }
  0x1c   :  { %p2243_p10 = scmp.ne.s32.totalorder %s91_s21, %s2242_s22  ;;  %p2248_p12 = scmp.lt.s32.totalorder %s2242_s22, %s2242_s22 }
  0x1e   :  { %p2249_p13 = por %p2248_p12, %p2247_p11 }
  0x20   :  { %p2250_p0 = pnand %p2249_p13, %p2243_p10 }
  0x22   :  { %2253 = shalt.err (!%p2250_p0)
}
  0x23   :  { %s2369_s2 = smov 256   ;;  %s2370_s23 = smov 16  }
  0x24   :  { %96 = dma.hbm_to_vmem [thread:$0]  %s3070_s7, 1024, %s91_s21, [#allocation14], %s2369_s2, %s2369_s2, %s2370_s23  }
  0x25   :  { %s2371_s26 = smov [#allocation4]   ;;  %s2372_s5 = smov [#allocation9]  }
  0x26   :  { %s28_s27 = sshll.u32 %s2371_s26, 4  ;;  %s54_s28 = sshll.u32 %s2372_s5, 4  ;;  %s29_s27 = int_to_ptr.vmem [resolvable:$true] %s28_s27  ;;  %s55_s28 = int_to_ptr.vmem [resolvable:$true] %s54_s28 }
  0x27   :  { %s2262_s29 = scalar_lea.vmem %s29_s27, 256  ;;  %p2267_p2 = scmp.lt.s32.totalorder %s29_s27, %s29_s27 }
  0x28   :  { %p2263_p1 = scmp.ne.s32.totalorder %s29_s27, %s2262_s29  ;;  %p2268_p3 = scmp.lt.s32.totalorder %s2262_s29, %s2262_s29 }
  0x2a   :  { %p2269_p4 = por %p2268_p3, %p2267_p2 }
  0x2c   :  { %p2270_p5 = pnand %p2269_p4, %p2263_p1 }
  0x2e   :  { %2273 = shalt.err (!%p2270_p5)
}
  0x2f   :  { %34 = dma.hbm_to_vmem [thread:$0]  %s3063_s0, 256, %s29_s27, [#allocation5], %s2366_s30, %s2366_s30, %s2367_s14  }
  0x30   :  { %s2282_s7 = scalar_lea.vmem %s55_s28, 512  ;;  %p2287_p7 = scmp.lt.s32.totalorder %s55_s28, %s55_s28 }
  0x31   :  { %p2283_p6 = scmp.ne.s32.totalorder %s55_s28, %s2282_s7  ;;  %p2288_p8 = scmp.lt.s32.totalorder %s2282_s7, %s2282_s7 }
  0x33   :  { %p2289_p9 = por %p2288_p8, %p2287_p7 }
  0x35   :  { %p2290_p10 = pnand %p2289_p9, %p2283_p6 }
  0x37   :  { %2293 = shalt.err (!%p2290_p10)
}
  0x38   :  { %60 = dma.hbm_to_vmem [thread:$0]  %s3066_s3, 512, %s55_s28, [#allocation8], %s2366_s30, %s2366_s30, %s2367_s14  }
  0x39   :  { %s2373_s19 = smov [#allocation12]   ;;  %s2374_s21 = smov [#allocation15]  }
  0x3a   :  { %s81_s20 = sshll.u32 %s2373_s19, 4  ;;  %s103_s0 = sshll.u32 %s2374_s21, 4  ;;  %s82_s20 = int_to_ptr.vmem [resolvable:$true] %s81_s20  ;;  %s104_s0 = int_to_ptr.vmem [resolvable:$true] %s103_s0 }
  0x3b   :  { %s2302_s22 = scalar_lea.vmem %s82_s20, 16  ;;  %s2306_s2 = scalar_lea.vmem %s82_s20, 32 }
  0x3c   :  { %p2303_p11 = scmp.ne.s32.totalorder %s82_s20, %s2302_s22  ;;  %p2307_p12 = scmp.lt.s32.totalorder %s82_s20, %s82_s20 }
  0x3d   :  { %p2308_p13 = scmp.lt.s32.totalorder %s2306_s2, %s2302_s22 }
  0x3f   :  { %p2309_p0 = por %p2308_p13, %p2307_p12 }
  0x41   :  { %p2310_p1 = pnand %p2309_p0, %p2303_p11 }
  0x43   :  { %2313 = shalt.err (!%p2310_p1)
}
  0x44   :  { %84 = dma.hbm_to_vmem [thread:$0]  %s3069_s6, 16, %s82_s20, [#allocation11]  }
  0x45   :  { %s2322_s25 = scalar_lea.vmem %s104_s0, 32  ;;  %p2327_p3 = scmp.lt.s32.totalorder %s104_s0, %s104_s0 }
  0x46   :  { %p2323_p2 = scmp.ne.s32.totalorder %s104_s0, %s2322_s25  ;;  %p2328_p4 = scmp.lt.s32.totalorder %s2322_s25, %s2322_s25 }
  0x48   :  { %p2329_p5 = por %p2328_p4, %p2327_p3 }
  0x4a   :  { %p2330_p6 = pnand %p2329_p5, %p2323_p2 }
  0x4c   :  { %2333 = shalt.err (!%p2330_p6)
}
  0x4d   :  { %106 = dma.hbm_to_vmem [thread:$0]  %s3071_s8, 32, %s104_s0, [#allocation14]  }
  0x4e   :  { %2354 = dma.done.wait [#allocation5], 256  }
  0x4f   :  { %2355 = vsyncadd [#allocation5], 4294967040 }
  0x50   :  { %2356 = dma.done.wait [#allocation8], 768  }
  0x51   :  { %2357 = vsyncadd [#allocation8], 4294966528 }
  0x52   :  { %2358 = dma.done.wait [#allocation11], 272  }
  0x53   :  { %2359 = vsyncadd [#allocation11], 4294967024 }
  0x54   :  { %2360 = dma.done.wait [#allocation14], 1056  }
  0x55   :  { %2361 = vsyncadd [#allocation14], 4294966240  ;;  %vm152_vm0 = vcmask 1043456   ;;  %vm145_vm1 = vcmask 31744   ;;  %v144_v0 = vld [vmem:[%s3067_s4] sm:$0xf]  ;;  %v426_v55 = vlaneseq }
  0x56   :  { %v142_v1 = vld [vmem:[%s3064_s1] sm:$0xff]  ;;  %v143_v2 = vld [vmem:[%s3064_s1 + $0x8] sm:$0xff]  ;;  %2063 = vmatprep.subr.msk.mxu1 %vm152_vm0, %v144_v0  ;;  %v316_v5 = vld [vmem:[#allocation10 + $0x8] sm:$0xff]  ;;  %vm231_vm2 = vcmask 261120   ;;  %vm317_vm3 = vcmask 130048   ;;  %v2375_v21 = vmov 0.0  }
  0x57   :  { %2065 = vmatprep.mubr.msk.f32.mxu1 %vm145_vm1, %v142_v1  ;;  %v141_v3 = vld [vmem:[#allocation9 + $0x18] sm:$0xff]  ;;  %2064 = vmatpush3.msk.msra.mxu1 %vm152_vm0, %v144_v0  ;;  %v140_v4 = vld [vmem:[#allocation9 + $0x10] sm:$0xff]  ;;  %v315_v6 = vld [vmem:[#allocation10] sm:$0xff]  ;;  %v427_v56 = vshrl.u32 %v426_v55, 7  ;;  %v2376_v58 = vmov 1983009808  }
  0x58   :  { %2066 = vmatmul.mubr.msk.f32.vlgmr.msra.gmra.mxu1 %vm145_vm1, %v143_v2  ;;  %2068 = vmatprep.subr.mxu1 %v141_v3  ;;  %v139_v7 = vld [vmem:[#allocation9 + $0x8] sm:$0xff]  ;;  %v136_v8 = vld [vmem:[#allocation4] sm:$0xff]  ;;  %v313_v10 = vld [vmem:[#allocation7] sm:$0xff]  ;;  %v525_v59 = vunpack.c.l.s4 %v2376_v58  ;;  %vm545_vm6 = vcmask 1041409   ;;  %vm547_vm7 = vcmask 1043459   ;;  %vm554_vm8 = vcmask 1041408  }
  0x59   :  { %2069 = vmatpush3.msra.mxu1 %v141_v3  ;;  %2079 = vmatprep.subr.mxu0 %v316_v5  ;;  %v138_v9 = vld [vmem:[#allocation9] sm:$0xff]  ;;  %v314_v11 = vld [vmem:[#allocation7 + $0x8] sm:$0xff]  ;;  %v137_v12 = vld [vmem:[#allocation4 + $0x8] sm:$0xff]  ;;  %v428_v57 = vsub.s32 0, %v427_v56  ;;  %v432_v60 = vsub.s32 1, %v427_v56  ;;  %vm555_vm9 = vcmask 519170  }
  0x5a   :  { %2070 = vmatprep.subr.mxu1 %v140_v4  ;;  %2080 = vmatpush3.msra.mxu0 %v316_v5  ;;  %v423_v13 = vld [vmem:[#allocation13 + $0x38] sm:$0xff]  ;;  %v422_v14 = vld [vmem:[#allocation13 + $0x30] sm:$0xff]  ;;  %v421_v15 = vld [vmem:[#allocation13 + $0x28] sm:$0xff]  ;;  %v526_v63 = vunpack.c.0.s8 %v525_v59  ;;  %vm549_vm10 = vcmask 1045509   ;;  %vm551_vm11 = vcmask 1047559   ;;  %s2377_s21 = smov 64  }
  0x5b   :  { %2071 = vmatpush3.msra.mxu1 %v140_v4  ;;  %2081 = vmatprep.subr.mxu0 %v315_v6  ;;  %v420_v16 = vld [vmem:[#allocation13 + $0x20] sm:$0xff]  ;;  %v419_v17 = vld [vmem:[#allocation13 + $0x18] sm:$0xff]  ;;  %v418_v18 = vld [vmem:[#allocation13 + $0x10] sm:$0xff]  ;;  %vm780_vm13 = vcmask 517120   ;;  %vm665_vm14 = vcmask 523264   ;;  %vm539_vm15 = vcmask 1042434  }
  0x5c   :  { %2072 = vmatprep.subr.mxu1 %v139_v7  ;;  %2076 = vmatprep.mubr.msk.f32.mxu1 %vm231_vm2, %v136_v8  ;;  %v417_v19 = vld [vmem:[#allocation13 + $0x8] sm:$0xff]  ;;  %v416_v20 = vld [vmem:[#allocation13] sm:$0xff]  ;;  %v2499_v22 = vld [vmem:[%s3072_s9 + $0x78] sm:$0xff]  ;;  %v2632_v4 = vsub.s32 %v526_v63, %v427_v56  ;;  %vm540_vm0 = vcmask 1044484   ;;  %vm542_vm1 = vcmask 1046534   ;;  %s2379_s15 = smov [#allocation16]  }
  0x5d   :  { %2073 = vmatpush3.msra.mxu1 %v139_v7  ;;  %2082 = vmatpush3.msra.mxu0 %v315_v6  ;;  %v2504_v23 = vld [vmem:[%s3072_s9 + $0x70] sm:$0xff]  ;;  %v2509_v24 = vld [vmem:[%s3072_s9 + $0x68] sm:$0xff]  ;;  %v2515_v25 = vld [vmem:[%s3072_s9 + $0x60] sm:$0xff]  ;;  %s1988_s16 = sshll.u32 %s2379_s15, 4  ;;  %s1989_s16 = int_to_ptr.vmem [resolvable:$true] %s1988_s16 }
  0x5e   :  { %2074 = vmatprep.subr.mxu1 %v138_v9  ;;  %2083 = vmatprep.mubr.msk.f32.mxu0 %vm317_vm3, %v313_v10  ;;  %v2522_v26 = vld [vmem:[%s3072_s9 + $0x58] sm:$0xff]  ;;  %v2528_v27 = vld [vmem:[%s3072_s9 + $0x50] sm:$0xff]  ;;  %v2534_v28 = vld [vmem:[%s3072_s9 + $0x48] sm:$0xff]  ;;  %s2334_s7 = scalar_lea.vmem %s1989_s16, 256  ;;  %p2339_p8 = scmp.lt.s32.totalorder %s1989_s16, %s1989_s16 }
  0x5f   :  { %2075 = vmatpush3.msra.mxu1 %v138_v9  ;;  %2084 = vmatmul.mubr.msk.f32.vlgmr.msra.gmra.mxu0 %vm317_vm3, %v314_v11  ;;  %v2540_v29 = vld [vmem:[%s3072_s9 + $0x40] sm:$0xff]  ;;  %v2546_v30 = vld [vmem:[%s3072_s9 + $0x38] sm:$0xff]  ;;  %v2552_v31 = vld [vmem:[%s3072_s9 + $0x30] sm:$0xff]  ;;  %vm1784_vm3 = vcmask 523265   ;;  %p2335_p7 = scmp.ne.s32.totalorder %s1989_s16, %s2334_s7  ;;  %p2340_p9 = scmp.lt.s32.totalorder %s2334_s7, %s2334_s7 }
  0x60   :  { %2077 = vmatmul.mubr.msk.f32.vlgmr.msra.gmra.mxu1 %vm231_vm2, %v137_v12  ;;  %466 = vmatprep.subr.mxu0 %v423_v13  ;;  %v2558_v32 = vld [vmem:[%s3072_s9 + $0x28] sm:$0xff]  ;;  %v2564_v33 = vld [vmem:[%s3072_s9 + $0x20] sm:$0xff]  ;;  %v2570_v34 = vld [vmem:[%s3072_s9 + $0x18] sm:$0xff] }
  0x61   :  { %467 = vmatpush1.msra.mxu0 %v422_v14  ;;  %506 = vmatprep.mubr.f32.mxu0 %v2375_v21  ;;  %v2576_v35 = vld [vmem:[%s3072_s9 + $0x10] sm:$0xff]  ;;  %v2582_v36 = vld [vmem:[%s3072_s9 + $0x8] sm:$0xff]  ;;  %v2588_v37 = vld [vmem:[%s3072_s9] sm:$0xff]  ;;  %p2341_p10 = por %p2340_p9, %p2339_p8 }
  0x62   :  { %468 = vmatprep.subr.mxu0 %v421_v15  ;;  %733 = vmatprep.mubr.f32.mxu1 %v2375_v21  ;;  %v2010_v46 = vld [vmem:[#allocation12] ss:$0 sm:$0xff]  ;;  %v424_v61 = vld [vmem:[#allocation15] sm:$0x3]  ;;  %vm2639_vm12 = vmor %vm555_vm9, %vm554_vm8 }
  0x63   :  { %469 = vmatpush1.msra.mxu0 %v420_v16  ;;  %685 = vmatprep.subr.mxu1 %v2499_v22  ;;  %v429_v62 = vrot.slane %v424_v61, %v428_v57  ;;  %v433_v0 = vrot.slane %v424_v61, %v432_v60  ;;  %p2342_p11 = pnand %p2341_p10, %p2335_p7 }
  0x64   :  { %470 = vmatprep.subr.mxu0 %v419_v17  ;;  %686 = vmatpush1.msra.mxu1 %v2504_v23 }
  0x65   :  { %471 = vmatpush1.msra.mxu0 %v418_v18  ;;  %687 = vmatprep.subr.mxu1 %v2509_v24 }
  0x66   :  { %472 = vmatprep.subr.mxu0 %v417_v19  ;;  %688 = vmatpush1.msra.mxu1 %v2515_v25 }
  0x67   :  { %473 = vmatpush1.msra.mxu0 %v416_v20  ;;  %689 = vmatprep.subr.mxu1 %v2522_v26 }
  0x68   :  { %800 = vmatprep.subr.mxu0 %v2499_v22  ;;  %690 = vmatpush1.msra.mxu1 %v2528_v27 }
  0x69   :  { %691 = vmatprep.subr.mxu1 %v2534_v28 }
  0x6a   :  { %692 = vmatpush1.msra.mxu1 %v2540_v29 }
  0x6b   :  { %693 = vmatprep.subr.mxu1 %v2546_v30 }
  0x6c   :  { %694 = vmatpush1.msra.mxu1 %v2552_v31 }
  0x6d   :  { %695 = vmatprep.subr.mxu1 %v2558_v32 }
  0x6e   :  { %696 = vmatpush1.msra.mxu1 %v2564_v33 }
  0x6f   :  { %697 = vmatprep.subr.mxu1 %v2570_v34 }
  0x70   :  { %698 = vmatpush1.msra.mxu1 %v2576_v35 }
  0x71   :  { %699 = vmatprep.subr.mxu1 %v2582_v36 }
  0x72   :  { %700 = vmatpush1.msra.mxu1 %v2588_v37 }
  0x73   :  { %734 = vmatmul.mubr.f32.vlgmr.msra.gmra.mxu1 %v2375_v21  ;;  %909 = vmatprep.subr.mxu1 %v2499_v22 }
  0x74   :  { %910 = vmatpush1.msra.mxu1 %v2504_v23  ;;  %957 = vmatprep.mubr.f32.mxu1 %v2375_v21 }
  0x75   :  { %911 = vmatprep.subr.mxu1 %v2509_v24 }
  0x76   :  { %912 = vmatpush1.msra.mxu1 %v2515_v25 }
  0x77   :  { %913 = vmatprep.subr.mxu1 %v2522_v26 }
  0x78   :  { %914 = vmatpush1.msra.mxu1 %v2528_v27 }
  0x79   :  { %915 = vmatprep.subr.mxu1 %v2534_v28 }
  0x7a   :  { %916 = vmatpush1.msra.mxu1 %v2540_v29 }
  0x7b   :  { %917 = vmatprep.subr.mxu1 %v2546_v30 }
  0x7c   :  { %918 = vmatpush1.msra.mxu1 %v2552_v31 }
  0x7d   :  { %919 = vmatprep.subr.mxu1 %v2558_v32 }
  0x7e   :  { %920 = vmatpush1.msra.mxu1 %v2564_v33 }
  0x7f   :  { %921 = vmatprep.subr.mxu1 %v2570_v34 }
  0x80   :  { %922 = vmatpush1.msra.mxu1 %v2576_v35 }
  0x81   :  { %923 = vmatprep.subr.mxu1 %v2582_v36 }
  0x82   :  { %924 = vmatpush1.msra.mxu1 %v2588_v37 }
  0x83   :  { %1127 = vmatprep.subr.mxu1 %v2499_v22 }
 0x118   :  { %v2067_v38 = vpop.f32.mrf.mxu1 }
 0x11a   :  { %v222_v39 = vpop.f32.mrf.mxu1 }
 0x11f   :  { %v2085_v41 = vpop.f32.mrf.mxu0 }
 0x120   :  { %v2078_v40 = vpop.f32.mrf.mxu1 }
 0x121   :  { %v310_v42 = vadd.f32 %v2078_v40, %v2067_v38  ;;  %v390_v47 = vpop.f32.mrf.mxu0 }
 0x122   :  { %v304_v43 = vpop.f32.mrf.mxu1 }
 0x123   :  { %v400_v44 = vadd.f32 %v2085_v41, %v310_v42  ;;  %v305_v45 = vadd.f32 %v304_v43, %v222_v39 }
 0x125   :  { %v399_v48 = vadd.f32 %v390_v47, %v305_v45  ;;  %v409_v49 = vadd.f32 %v2010_v46, %v400_v44 }
 0x127   :  { %v408_v50 = vadd.f32 %v2010_v46, %v399_v48  ;;  %v413_v52 = vmul.f32 0.1, %v409_v49  ;;  %vm411_vm5 = vcmp.ge.f32.partialorder %v409_v49, 0.0 }
 0x129   :  { %vm410_vm4 = vcmp.ge.f32.partialorder %v408_v50, 0.0  ;;  %v412_v51 = vmul.f32 0.1, %v408_v50  ;;  %v415_v54 = vsel %vm411_vm5, %v409_v49, %v413_v52  ;;  %vm2378_vm5 = vmmov 0  }
 0x12b   :  { %v414_v53 = vsel %vm410_vm4, %v408_v50, %v412_v51  ;;  %vm1788_vm4 = vcmask 516096  }
 0x12c   :  { %2011 = vmatmul.mubr.msk.f32.vlgmr.msra.gmra.mxu0 %vm231_vm2, %v414_v53 }
 0x12d   :  { %512 = vmatprep.mubr.f32.mxu0 %v2375_v21  ;;  %801 = vmatpush1.msra.mxu0 %v2504_v23 }
 0x12e   :  { %802 = vmatprep.subr.mxu0 %v2509_v24 }
 0x12f   :  { %803 = vmatpush1.msra.mxu0 %v2515_v25 }
 0x130   :  { %2012 = vmatmul.mubr.msk.f32.gmra.mxu0 %vm231_vm2, %v415_v54  ;;  %804 = vmatprep.subr.mxu0 %v2522_v26 }
 0x131   :  { %805 = vmatpush1.msra.mxu0 %v2528_v27  ;;  %848 = vmatprep.mubr.f32.mxu0 %v2375_v21 }
 0x132   :  { %806 = vmatprep.subr.mxu0 %v2534_v28 }
 0x133   :  { %807 = vmatpush1.msra.mxu0 %v2540_v29 }
 0x134   :  { %808 = vmatprep.subr.mxu0 %v2546_v30 }
 0x135   :  { %809 = vmatpush1.msra.mxu0 %v2552_v31 }
 0x136   :  { %810 = vmatprep.subr.mxu0 %v2558_v32 }
 0x137   :  { %811 = vmatpush1.msra.mxu0 %v2564_v33 }
 0x138   :  { %812 = vmatprep.subr.mxu0 %v2570_v34 }
 0x139   :  { %813 = vmatpush1.msra.mxu0 %v2576_v35 }
 0x13a   :  { %814 = vmatprep.subr.mxu0 %v2582_v36 }
 0x13b   :  { %815 = vmatpush1.msra.mxu0 %v2588_v37 }
 0x13c   :  { %1018 = vmatprep.subr.mxu0 %v2499_v22 }
 0x1ec   :  { %v508_v1 = vpop.f32.mrf.mxu0 }
 0x1ed   :  { %v509_v3 = vadd.f32 %v508_v1, %v429_v62 }
 0x1ee   :  { %v510_v2 = vpop.f32.mrf.mxu0 }
 0x1ef   :  { %v511_v5 = vadd.f32 %v510_v2, %v433_v0 }
 0x1f0   :  { %v514_v6 = vpop.f32.mrf.mxu0 }
 0x1f1   :  { %v523_v7 = vcombine.low %v509_v3, %v511_v5  ;;  %v590_v8 = vcombine.high %v509_v3, %v511_v5  ;;  %v515_v13 = vadd.f32 %v514_v6, %v429_v62 }
 0x1f2   :  { %v516_v9 = vpop.f32.mrf.mxu0 }
 0x1f3   :  { %v530_v10 = vrot.slane %v523_v7, %v2632_v4  ;;  %v597_v11 = vrot.slane %v590_v8, %v2632_v4  ;;  %v517_v12 = vadd.f32 %v516_v9, %v433_v0 }
 0x1f5   :  { %v568_v14 = vcombine.high %v530_v10, %v530_v10  ;;  %v531_v15 = vcombine.low %v515_v13, %v517_v12  ;;  %v598_v16 = vcombine.high %v515_v13, %v517_v12  ;;  %v626_v17 = vcombine.high %v597_v11, %v597_v11 }
 0x1f6   :  { %v558_v18 = vrot.slane %v530_v10, 1  ;;  %v616_v39 = vrot.slane %v597_v11, 1 }
 0x1f7   :  { %v538_v19 = vrot.slane %v531_v15, %v2632_v4  ;;  %v605_v20 = vrot.slane %v598_v16, %v2632_v4  ;;  %v580_v38 = vrot.slane %v568_v14, 1  ;;  %v638_v44 = vrot.slane %v626_v17, 1 }
 0x1f9   :  { %v544_v40 = vrot.slane %v538_v19, 7  ;;  %v561_v41 = vsel %vm545_vm6, %v538_v19, %v558_v18  ;;  %v569_v42 = vcombine.high %v538_v19, %v538_v19  ;;  %v608_v43 = vrot.slane %v605_v20, 7 }
 0x1fa   :  { %v562_v46 = vsel %vm547_vm7, %v538_v19, %v561_v41  ;;  %v619_v47 = vsel %vm545_vm6, %v605_v20, %v616_v39  ;;  %v627_v48 = vcombine.high %v605_v20, %v605_v20 }
 0x1fb   :  { %v546_v49 = vsel %vm545_vm6, %v544_v40, %v530_v10  ;;  %v563_v50 = vsel %vm549_vm10, %v538_v19, %v562_v46  ;;  %v572_v51 = vrot.slane %v569_v42, 7  ;;  %v583_v52 = vsel %vm545_vm6, %v569_v42, %v580_v38 }
 0x1fc   :  { %v548_v53 = vsel %vm547_vm7, %v544_v40, %v546_v49  ;;  %v564_v54 = vsel %vm551_vm11, %v538_v19, %v563_v50  ;;  %v584_v55 = vsel %vm547_vm7, %v569_v42, %v583_v52  ;;  %v609_v56 = vsel %vm545_vm6, %v608_v43, %v597_v11 }
 0x1fd   :  { %v550_v57 = vsel %vm549_vm10, %v544_v40, %v548_v53  ;;  %567 = vst.msk [vmem:[#allocation2 + $0x4] sm:$0xf] %vm2639_vm12, %v564_v54  ;;  %v585_v58 = vsel %vm549_vm10, %v569_v42, %v584_v55  ;;  %v610_v59 = vsel %vm547_vm7, %v608_v43, %v609_v56  ;;  %v620_v60 = vsel %vm547_vm7, %v605_v20, %v619_v47 }
 0x1fe   :  { %v552_v61 = vsel %vm551_vm11, %v544_v40, %v550_v57  ;;  %v586_v62 = vsel %vm551_vm11, %v569_v42, %v585_v58  ;;  %v611_v63 = vsel %vm549_vm10, %v608_v43, %v610_v59  ;;  %v621_v0 = vsel %vm549_vm10, %v605_v20, %v620_v60  ;;  %v2693_v40 = vld [vmem:[%s3073_s10] ss:$0 sm:$0xff] }
 0x1ff   :  { %557 = vst.msk [vmem:[#allocation2] sm:$0xf] %vm2639_vm12, %v552_v61  ;;  %v612_v1 = vsel %vm551_vm11, %v608_v43, %v611_v63  ;;  %v622_v2 = vsel %vm551_vm11, %v605_v20, %v621_v0  ;;  %v630_v3 = vrot.slane %v627_v48, 7  ;;  %v641_v5 = vsel %vm545_vm6, %v627_v48, %v638_v44  ;;  %589 = vst.msk [vmem:[#allocation2 + $0xc] sm:$0xf] %vm2639_vm12, %v586_v62 }
 0x200   :  { %615 = vst.msk [vmem:[#allocation2 + $0x10] sm:$0xf] %vm2639_vm12, %v612_v1  ;;  %625 = vst.msk [vmem:[#allocation2 + $0x14] sm:$0xf] %vm2639_vm12, %v622_v2  ;;  %v642_v6 = vsel %vm547_vm7, %v627_v48, %v641_v5  ;;  %v573_v7 = vsel %vm545_vm6, %v572_v51, %v568_v14 }
 0x201   :  { %v643_v8 = vsel %vm549_vm10, %v627_v48, %v642_v6  ;;  %v574_v9 = vsel %vm547_vm7, %v572_v51, %v573_v7  ;;  %v631_v10 = vsel %vm545_vm6, %v630_v3, %v626_v17  ;;  %v735_v17 = vpop.f32.mrf.mxu1 }
 0x202   :  { %v644_v11 = vsel %vm551_vm11, %v627_v48, %v643_v8  ;;  %v575_v12 = vsel %vm549_vm10, %v572_v51, %v574_v9  ;;  %v632_v13 = vsel %vm547_vm7, %v630_v3, %v631_v10 }
 0x203   :  { %647 = vst.msk [vmem:[#allocation2 + $0x1c] sm:$0xf] %vm2639_vm12, %v644_v11  ;;  %v576_v15 = vsel %vm551_vm11, %v572_v51, %v575_v12  ;;  %v633_v16 = vsel %vm549_vm10, %v630_v3, %v632_v13  ;;  %v737_v41 = vpop.f32.mrf.mxu1 }
 0x204   :  { %579 = vst.msk [vmem:[#allocation2 + $0x8] sm:$0xf] %vm2639_vm12, %v576_v15  ;;  %v634_v14 = vsel %vm551_vm11, %v630_v3, %v633_v16  ;;  %v754_v42 = vadd.f32 %v2693_v40, %v737_v41  ;;  %v855_v56 = vld [vmem:[#allocation2 + $0x4] sm:$0xf] }
 0x205   :  { %637 = vst.msk [vmem:[#allocation2 + $0x18] sm:$0xf] %vm2639_vm12, %v634_v14  ;;  %v866_v0 = vrot.slane %v855_v56, 2 }
 0x206   :  { %v740_v18 = vld [vmem:[#allocation2] sm:$0xf] }
 0x207   :  { %v741_v19 = vadd.f32 %v740_v18, %v735_v17  ;;  %v757_v44 = vrot.slane %v740_v18, 2 }
 0x209   :  { %v2013_v20 = vmul.f32 -1.442695, %v741_v19 }
 0x20b   :  { %2140 = vpow2.f32 %v2013_v20  ;;  %v964_v13 = vld [vmem:[#allocation2 + $0x8] sm:$0xf] }
 0x218   :  { %v2141_v38 = vpop.eup %2140 }
 0x219   :  { %v745_v39 = vadd.f32 1.0, %v2141_v38  ;;  %v975_v38 = vrot.slane %v964_v13, 2 }
 0x21b   :  { %2142 = vrcp.f32 %v745_v39 }
 0x228   :  { %v2143_v43 = vpop.eup %2142 }
 0x229   :  { %v755_v45 = vmul.f32 %v2143_v43, %v754_v42  ;;  %v761_v48 = vsub.f32 1.0, %v2143_v43  ;;  %v767_v50 = vmul.f32 0.0, %v2143_v43 }
 0x22b   :  { %v759_v46 = vadd.f32 %v757_v44, %v755_v45 }
 0x22d   :  { %2144 = vtanh.f32 %v759_v46 }
 0x23a   :  { %v2145_v47 = vpop.eup %2144 }
 0x23b   :  { %763 = vrot.lane.b32.xlu0 %v2145_v47, %s2377_s21 }
 0x2ad   :  { %v764_v49 = vpop.permute.xlu0 %763 }
 0x2ae   :  { %v766_v51 = vmul.f32 %v764_v49, %v761_v48 }
 0x2b0   :  { %v768_v52 = vadd.f32 %v767_v50, %v766_v51 }
 0x2b2   :  { %v776_v53 = vrot.slane %v768_v52, %v2632_v4 }
 0x2b4   :  { %777 = vrot.lane.b32.xlu0 %v776_v53, %s2377_s21 }
 0x326   :  { %v778_v54 = vpop.permute.xlu0 %777 }
 0x327   :  { %781 = vst.msk [vmem:[#allocation3] sm:$0x3] %vm780_vm13, %v778_v54  ;;  %2015 = vmatmul.mubr.msk.f32.vlgmr.msra.gmra.mxu0 %vm665_vm14, %v778_v54 }
 0x328   :  { %1019 = vmatpush1.msra.mxu0 %v2504_v23  ;;  %1066 = vmatprep.mubr.f32.mxu0 %v2375_v21 }
 0x329   :  { %1020 = vmatprep.subr.mxu0 %v2509_v24 }
 0x32a   :  { %1021 = vmatpush1.msra.mxu0 %v2515_v25 }
 0x32b   :  { %1022 = vmatprep.subr.mxu0 %v2522_v26 }
 0x32c   :  { %1023 = vmatpush1.msra.mxu0 %v2528_v27 }
 0x32d   :  { %1024 = vmatprep.subr.mxu0 %v2534_v28 }
 0x32e   :  { %1025 = vmatpush1.msra.mxu0 %v2540_v29  ;;  %v2761_v53 = vld [vmem:[#allocation3] sm:$0x3] }
 0x32f   :  { %1026 = vmatprep.subr.mxu0 %v2546_v30 }
 0x330   :  { %1027 = vmatpush1.msra.mxu0 %v2552_v31 }
 0x331   :  { %1028 = vmatprep.subr.mxu0 %v2558_v32 }
 0x332   :  { %1029 = vmatpush1.msra.mxu0 %v2564_v33 }
 0x333   :  { %1030 = vmatprep.subr.mxu0 %v2570_v34 }
 0x334   :  { %1031 = vmatpush1.msra.mxu0 %v2576_v35 }
 0x335   :  { %1032 = vmatprep.subr.mxu0 %v2582_v36 }
 0x336   :  { %1033 = vmatpush1.msra.mxu0 %v2588_v37 }
 0x337   :  { %1236 = vmatprep.subr.mxu0 %v2499_v22 }
 0x3e7   :  { %v850_v55 = vpop.f32.mrf.mxu0 }
 0x3e8   :  { %v856_v57 = vadd.f32 %v855_v56, %v850_v55 }
 0x3e9   :  { %v852_v61 = vpop.f32.mrf.mxu0 }
 0x3ea   :  { %v2016_v58 = vmul.f32 -1.442695, %v856_v57  ;;  %v863_v62 = vadd.f32 %v2693_v40, %v852_v61 }
 0x3ec   :  { %2146 = vpow2.f32 %v2016_v58  ;;  %v1073_v58 = vld [vmem:[#allocation2 + $0xc] sm:$0xf] }
 0x3f9   :  { %v2147_v59 = vpop.eup %2146 }
 0x3fa   :  { %v860_v60 = vadd.f32 1.0, %v2147_v59 }
 0x3fc   :  { %2148 = vrcp.f32 %v860_v60 }
 0x409   :  { %v2149_v63 = vpop.eup %2148 }
 0x40a   :  { %v864_v1 = vmul.f32 %v2149_v63, %v863_v62  ;;  %v870_v5 = vsub.f32 1.0, %v2149_v63  ;;  %v876_v7 = vmul.f32 %v2149_v63, %v768_v52 }
 0x40c   :  { %v868_v2 = vadd.f32 %v866_v0, %v864_v1 }
 0x40e   :  { %2150 = vtanh.f32 %v868_v2  ;;  %v1084_v2 = vrot.slane %v1073_v58, 2 }
 0x41b   :  { %v2151_v3 = vpop.eup %2150 }
 0x41c   :  { %872 = vrot.lane.b32.xlu1 %v2151_v3, %s2377_s21 }
 0x48e   :  { %v873_v6 = vpop.permute.xlu1 %872 }
 0x48f   :  { %v875_v8 = vmul.f32 %v873_v6, %v870_v5 }
 0x491   :  { %v877_v9 = vadd.f32 %v876_v7, %v875_v8 }
 0x493   :  { %v885_v10 = vrot.slane %v877_v9, %v2632_v4 }
 0x495   :  { %886 = vrot.lane.b32.xlu1 %v885_v10, %s2377_s21 }
 0x507   :  { %v887_v11 = vpop.permute.xlu1 %886 }
 0x508   :  { %890 = vst.msk [vmem:[#allocation3 + $0x2] sm:$0x3] %vm780_vm13, %v887_v11  ;;  %2017 = vmatmul.mubr.msk.f32.vlgmr.msra.gmra.mxu1 %vm665_vm14, %v887_v11 }
 0x509   :  { %1128 = vmatpush1.msra.mxu1 %v2504_v23  ;;  %1175 = vmatprep.mubr.f32.mxu1 %v2375_v21 }
 0x50a   :  { %1129 = vmatprep.subr.mxu1 %v2509_v24 }
 0x50b   :  { %1130 = vmatpush1.msra.mxu1 %v2515_v25 }
 0x50c   :  { %1131 = vmatprep.subr.mxu1 %v2522_v26 }
 0x50d   :  { %1132 = vmatpush1.msra.mxu1 %v2528_v27 }
 0x50e   :  { %1133 = vmatprep.subr.mxu1 %v2534_v28 }
 0x50f   :  { %1134 = vmatpush1.msra.mxu1 %v2540_v29  ;;  %v2750_v50 = vld [vmem:[#allocation3 + $0x2] sm:$0x3] }
 0x510   :  { %1135 = vmatprep.subr.mxu1 %v2546_v30  ;;  %v1570_v51 = vrot.slane %v2750_v50, 7 }
 0x511   :  { %1136 = vmatpush1.msra.mxu1 %v2552_v31 }
 0x512   :  { %1137 = vmatprep.subr.mxu1 %v2558_v32  ;;  %v1571_v55 = vsel %vm545_vm6, %v1570_v51, %v2761_v53 }
 0x513   :  { %1138 = vmatpush1.msra.mxu1 %v2564_v33 }
 0x514   :  { %1139 = vmatprep.subr.mxu1 %v2570_v34 }
 0x515   :  { %1140 = vmatpush1.msra.mxu1 %v2576_v35 }
 0x516   :  { %1141 = vmatprep.subr.mxu1 %v2582_v36 }
 0x517   :  { %1142 = vmatpush1.msra.mxu1 %v2588_v37 }
 0x518   :  { %1345 = vmatprep.subr.mxu1 %v2499_v22 }
 0x5c8   :  { %v959_v12 = vpop.f32.mrf.mxu1 }
 0x5c9   :  { %v965_v15 = vadd.f32 %v964_v13, %v959_v12 }
 0x5ca   :  { %v961_v18 = vpop.f32.mrf.mxu1 }
 0x5cb   :  { %v2018_v16 = vmul.f32 -1.442695, %v965_v15  ;;  %v972_v19 = vadd.f32 %v2693_v40, %v961_v18 }
 0x5cd   :  { %2152 = vpow2.f32 %v2018_v16 }
 0x5da   :  { %v2153_v14 = vpop.eup %2152 }
 0x5db   :  { %v969_v17 = vadd.f32 1.0, %v2153_v14 }
 0x5dd   :  { %2154 = vrcp.f32 %v969_v17  ;;  %v1182_v17 = vld [vmem:[#allocation2 + $0x10] sm:$0xf] }
 0x5ea   :  { %v2155_v20 = vpop.eup %2154 }
 0x5eb   :  { %v973_v39 = vmul.f32 %v2155_v20, %v972_v19  ;;  %v979_v43 = vsub.f32 1.0, %v2155_v20  ;;  %v985_v45 = vmul.f32 %v2155_v20, %v877_v9 }
 0x5ed   :  { %v977_v41 = vadd.f32 %v975_v38, %v973_v39 }
 0x5ef   :  { %2156 = vtanh.f32 %v977_v41 }
 0x5fc   :  { %v2157_v42 = vpop.eup %2156 }
 0x5fd   :  { %981 = vrot.lane.b32.xlu0 %v2157_v42, %s2377_s21 }
 0x66f   :  { %v982_v44 = vpop.permute.xlu0 %981 }
 0x670   :  { %v984_v46 = vmul.f32 %v982_v44, %v979_v43  ;;  %v1193_v43 = vrot.slane %v1182_v17, 2 }
 0x672   :  { %v986_v47 = vadd.f32 %v985_v45, %v984_v46 }
 0x674   :  { %v994_v48 = vrot.slane %v986_v47, %v2632_v4 }
 0x676   :  { %995 = vrot.lane.b32.xlu1 %v994_v48, %s2377_s21 }
 0x6e8   :  { %v996_v49 = vpop.permute.xlu1 %995 }
 0x6e9   :  { %999 = vst.msk [vmem:[#allocation3 + $0x4] sm:$0x3] %vm780_vm13, %v996_v49  ;;  %2019 = vmatmul.mubr.msk.f32.vlgmr.msra.gmra.mxu0 %vm665_vm14, %v996_v49 }
 0x6ea   :  { %1237 = vmatpush1.msra.mxu0 %v2504_v23  ;;  %1284 = vmatprep.mubr.f32.mxu0 %v2375_v21 }
 0x6eb   :  { %1238 = vmatprep.subr.mxu0 %v2509_v24 }
 0x6ec   :  { %1239 = vmatpush1.msra.mxu0 %v2515_v25 }
 0x6ed   :  { %1240 = vmatprep.subr.mxu0 %v2522_v26 }
 0x6ee   :  { %1241 = vmatpush1.msra.mxu0 %v2528_v27 }
 0x6ef   :  { %1242 = vmatprep.subr.mxu0 %v2534_v28 }
 0x6f0   :  { %1243 = vmatpush1.msra.mxu0 %v2540_v29  ;;  %v2758_v52 = vld [vmem:[#allocation3 + $0x4] sm:$0x3] }
 0x6f1   :  { %1244 = vmatprep.subr.mxu0 %v2546_v30  ;;  %v1572_v54 = vrot.slane %v2758_v52, 6 }
 0x6f2   :  { %1245 = vmatpush1.msra.mxu0 %v2552_v31 }
 0x6f3   :  { %1246 = vmatprep.subr.mxu0 %v2558_v32  ;;  %v1573_v56 = vsel %vm539_vm15, %v1572_v54, %v1571_v55 }
 0x6f4   :  { %1247 = vmatpush1.msra.mxu0 %v2564_v33 }
 0x6f5   :  { %1248 = vmatprep.subr.mxu0 %v2570_v34 }
 0x6f6   :  { %1249 = vmatpush1.msra.mxu0 %v2576_v35 }
 0x6f7   :  { %1250 = vmatprep.subr.mxu0 %v2582_v36 }
 0x6f8   :  { %1251 = vmatpush1.msra.mxu0 %v2588_v37 }
 0x6f9   :  { %1454 = vmatprep.subr.mxu0 %v2499_v22 }
 0x7a9   :  { %v1068_v57 = vpop.f32.mrf.mxu0 }
 0x7aa   :  { %v1074_v59 = vadd.f32 %v1073_v58, %v1068_v57 }
 0x7ab   :  { %v1070_v63 = vpop.f32.mrf.mxu0 }
 0x7ac   :  { %v2020_v60 = vmul.f32 -1.442695, %v1074_v59  ;;  %v1081_v0 = vadd.f32 %v2693_v40, %v1070_v63 }
 0x7ae   :  { %2158 = vpow2.f32 %v2020_v60 }
 0x7bb   :  { %v2159_v61 = vpop.eup %2158 }
 0x7bc   :  { %v1078_v62 = vadd.f32 1.0, %v2159_v61 }
 0x7be   :  { %2160 = vrcp.f32 %v1078_v62 }
 0x7cb   :  { %v2161_v1 = vpop.eup %2160 }
 0x7cc   :  { %v1082_v3 = vmul.f32 %v2161_v1, %v1081_v0  ;;  %v1088_v22 = vsub.f32 1.0, %v2161_v1  ;;  %v1094_v8 = vmul.f32 %v2161_v1, %v986_v47 }
 0x7ce   :  { %v1086_v5 = vadd.f32 %v1084_v2, %v1082_v3 }
 0x7d0   :  { %2162 = vtanh.f32 %v1086_v5 }
 0x7dd   :  { %v2163_v6 = vpop.eup %2162 }
 0x7de   :  { %1090 = vrot.lane.b32.xlu0 %v2163_v6, %s2377_s21 }
 0x850   :  { %v1091_v7 = vpop.permute.xlu0 %1090 }
 0x851   :  { %v1093_v9 = vmul.f32 %v1091_v7, %v1088_v22  ;;  %v1400_v7 = vld [vmem:[#allocation2 + $0x18] sm:$0xf] }
 0x853   :  { %v1095_v10 = vadd.f32 %v1094_v8, %v1093_v9 }
 0x855   :  { %v1103_v11 = vrot.slane %v1095_v10, %v2632_v4 }
 0x857   :  { %1104 = vrot.lane.b32.xlu1 %v1103_v11, %s2377_s21 }
 0x8c9   :  { %v1105_v12 = vpop.permute.xlu1 %1104 }
 0x8ca   :  { %1108 = vst.msk [vmem:[#allocation3 + $0x6] sm:$0x3] %vm780_vm13, %v1105_v12  ;;  %2021 = vmatmul.mubr.msk.f32.vlgmr.msra.gmra.mxu1 %vm665_vm14, %v1105_v12 }
 0x8cb   :  { %1346 = vmatpush1.msra.mxu1 %v2504_v23  ;;  %1393 = vmatprep.mubr.f32.mxu1 %v2375_v21 }
 0x8cc   :  { %1347 = vmatprep.subr.mxu1 %v2509_v24 }
 0x8cd   :  { %1348 = vmatpush1.msra.mxu1 %v2515_v25 }
 0x8ce   :  { %1349 = vmatprep.subr.mxu1 %v2522_v26 }
 0x8cf   :  { %1350 = vmatpush1.msra.mxu1 %v2528_v27 }
 0x8d0   :  { %1351 = vmatprep.subr.mxu1 %v2534_v28 }
 0x8d1   :  { %1352 = vmatpush1.msra.mxu1 %v2540_v29  ;;  %v2793_v13 = vld [vmem:[#allocation3 + $0x6] sm:$0x3] }
 0x8d2   :  { %1353 = vmatprep.subr.mxu1 %v2546_v30  ;;  %v1574_v15 = vrot.slane %v2793_v13, 5 }
 0x8d3   :  { %1354 = vmatpush1.msra.mxu1 %v2552_v31 }
 0x8d4   :  { %1355 = vmatprep.subr.mxu1 %v2558_v32  ;;  %v1575_v16 = vsel %vm547_vm7, %v1574_v15, %v1573_v56 }
 0x8d5   :  { %1356 = vmatpush1.msra.mxu1 %v2564_v33 }
 0x8d6   :  { %1357 = vmatprep.subr.mxu1 %v2570_v34 }
 0x8d7   :  { %1358 = vmatpush1.msra.mxu1 %v2576_v35 }
 0x8d8   :  { %1359 = vmatprep.subr.mxu1 %v2582_v36 }
 0x8d9   :  { %1360 = vmatpush1.msra.mxu1 %v2588_v37 }
 0x8da   :  { %2086 = vmatprep.subr.mxu1 %v2375_v21 }
 0x98a   :  { %v1177_v14 = vpop.f32.mrf.mxu1 }
 0x98b   :  { %v1183_v18 = vadd.f32 %v1182_v17, %v1177_v14  ;;  %v1411_v17 = vrot.slane %v1400_v7, 2 }
 0x98c   :  { %v1179_v39 = vpop.f32.mrf.mxu1 }
 0x98d   :  { %v2022_v19 = vmul.f32 -1.442695, %v1183_v18  ;;  %v1190_v41 = vadd.f32 %v2693_v40, %v1179_v39 }
 0x98f   :  { %2164 = vpow2.f32 %v2022_v19 }
 0x99c   :  { %v2165_v20 = vpop.eup %2164 }
 0x99d   :  { %v1187_v38 = vadd.f32 1.0, %v2165_v20 }
 0x99f   :  { %2166 = vrcp.f32 %v1187_v38 }
 0x9ac   :  { %v2167_v42 = vpop.eup %2166 }
 0x9ad   :  { %v1191_v44 = vmul.f32 %v2167_v42, %v1190_v41  ;;  %v1197_v47 = vsub.f32 1.0, %v2167_v42  ;;  %v1203_v49 = vmul.f32 %v2167_v42, %v1095_v10 }
 0x9af   :  { %v1195_v45 = vadd.f32 %v1193_v43, %v1191_v44 }
 0x9b1   :  { %2168 = vtanh.f32 %v1195_v45 }
 0x9be   :  { %v2169_v46 = vpop.eup %2168 }
 0x9bf   :  { %1199 = vrot.lane.b32.xlu0 %v2169_v46, %s2377_s21 }
 0xa31   :  { %v1200_v48 = vpop.permute.xlu0 %1199 }
 0xa32   :  { %v1202_v55 = vmul.f32 %v1200_v48, %v1197_v47 }
 0xa34   :  { %v1204_v56 = vadd.f32 %v1203_v49, %v1202_v55  ;;  %v1509_v55 = vld [vmem:[#allocation2 + $0x1c] sm:$0xf] }
 0xa36   :  { %v1212_v57 = vrot.slane %v1204_v56, %v2632_v4 }
 0xa38   :  { %1213 = vrot.lane.b32.xlu1 %v1212_v57, %s2377_s21 }
 0xaaa   :  { %v1214_v58 = vpop.permute.xlu1 %1213 }
 0xaab   :  { %1217 = vst.msk [vmem:[#allocation3 + $0x8] sm:$0x3] %vm780_vm13, %v1214_v58  ;;  %2023 = vmatmul.mubr.msk.f32.vlgmr.msra.gmra.mxu0 %vm665_vm14, %v1214_v58 }
 0xaac   :  { %1455 = vmatpush1.msra.mxu0 %v2504_v23  ;;  %1502 = vmatprep.mubr.f32.mxu0 %v2375_v21 }
 0xaad   :  { %1456 = vmatprep.subr.mxu0 %v2509_v24 }
 0xaae   :  { %1457 = vmatpush1.msra.mxu0 %v2515_v25 }
 0xaaf   :  { %1458 = vmatprep.subr.mxu0 %v2522_v26  ;;  %v1291_v26 = vld [vmem:[#allocation2 + $0x14] sm:$0xf] }
 0xab0   :  { %1459 = vmatpush1.msra.mxu0 %v2528_v27 }
 0xab1   :  { %1460 = vmatprep.subr.mxu0 %v2534_v28 }
 0xab2   :  { %1461 = vmatpush1.msra.mxu0 %v2540_v29  ;;  %v2822_v59 = vld [vmem:[#allocation3 + $0x8] sm:$0x3] }
 0xab3   :  { %1462 = vmatprep.subr.mxu0 %v2546_v30  ;;  %v1576_v23 = vrot.slane %v2822_v59, 4 }
 0xab4   :  { %1463 = vmatpush1.msra.mxu0 %v2552_v31 }
 0xab5   :  { %1464 = vmatprep.subr.mxu0 %v2558_v32  ;;  %v1577_v24 = vsel %vm540_vm0, %v1576_v23, %v1575_v16 }
 0xab6   :  { %1465 = vmatpush1.msra.mxu0 %v2564_v33 }
 0xab7   :  { %1466 = vmatprep.subr.mxu0 %v2570_v34  ;;  %v1302_v34 = vrot.slane %v1291_v26, 2 }
 0xab8   :  { %1467 = vmatpush1.msra.mxu0 %v2576_v35 }
 0xab9   :  { %1468 = vmatprep.subr.mxu0 %v2582_v36 }
 0xaba   :  { %1469 = vmatpush1.msra.mxu0 %v2588_v37 }
 0xabb   :  { %2105 = vmatprep.subr.mxu0 %v2375_v21 }
 0xb6b   :  { %v1286_v25 = vpop.f32.mrf.mxu0 }
 0xb6c   :  { %v1292_v27 = vadd.f32 %v1291_v26, %v1286_v25 }
 0xb6d   :  { %v1288_v31 = vpop.f32.mrf.mxu0 }
 0xb6e   :  { %v2024_v28 = vmul.f32 -1.442695, %v1292_v27  ;;  %v1299_v32 = vadd.f32 %v2693_v40, %v1288_v31 }
 0xb70   :  { %2170 = vpow2.f32 %v2024_v28  ;;  %v1520_v28 = vrot.slane %v1509_v55, 2 }
 0xb7d   :  { %v2171_v29 = vpop.eup %2170 }
 0xb7e   :  { %v1296_v30 = vadd.f32 1.0, %v2171_v29 }
 0xb80   :  { %2172 = vrcp.f32 %v1296_v30 }
 0xb8d   :  { %v2173_v33 = vpop.eup %2172 }
 0xb8e   :  { %v1300_v35 = vmul.f32 %v2173_v33, %v1299_v32  ;;  %v1306_v37 = vsub.f32 1.0, %v2173_v33  ;;  %v1312_v62 = vmul.f32 %v2173_v33, %v1204_v56 }
 0xb90   :  { %v1304_v60 = vadd.f32 %v1302_v34, %v1300_v35 }
 0xb92   :  { %2174 = vtanh.f32 %v1304_v60 }
 0xb9f   :  { %v2175_v36 = vpop.eup %2174 }
 0xba0   :  { %1308 = vrot.lane.b32.xlu0 %v2175_v36, %s2377_s21 }
 0xc12   :  { %v1309_v61 = vpop.permute.xlu0 %1308 }
 0xc13   :  { %v1311_v63 = vmul.f32 %v1309_v61, %v1306_v37 }
 0xc15   :  { %v1313_v0 = vadd.f32 %v1312_v62, %v1311_v63 }
 0xc17   :  { %v1321_v1 = vrot.slane %v1313_v0, %v2632_v4 }
 0xc19   :  { %1322 = vrot.lane.b32.xlu1 %v1321_v1, %s2377_s21 }
 0xc8b   :  { %v1323_v2 = vpop.permute.xlu1 %1322 }
 0xc8c   :  { %1326 = vst.msk [vmem:[#allocation3 + $0xa] sm:$0x3] %vm780_vm13, %v1323_v2  ;;  %2025 = vmatmul.mubr.msk.f32.vlgmr.msra.gmra.mxu1 %vm665_vm14, %v1323_v2 }
 0xc8d   :  { %2102 = vmatprep.mubr.msk.f32.mxu1 %vm2378_vm5, %v2375_v21 }
 0xc93   :  { %v2843_v3 = vld [vmem:[#allocation3 + $0xa] sm:$0x3] }
 0xc94   :  { %v1578_v5 = vrot.slane %v2843_v3, 3 }
 0xc96   :  { %v1579_v6 = vsel %vm549_vm10, %v1578_v5, %v1577_v24 }
 0xd4c   :  { %v1395_v22 = vpop.f32.mrf.mxu1 }
 0xd4d   :  { %v1401_v8 = vadd.f32 %v1400_v7, %v1395_v22 }
 0xd4e   :  { %v1397_v12 = vpop.f32.mrf.mxu1 }
 0xd4f   :  { %v2026_v9 = vmul.f32 -1.442695, %v1401_v8  ;;  %v1408_v16 = vadd.f32 %v2693_v40, %v1397_v12 }
 0xd51   :  { %2176 = vpow2.f32 %v2026_v9 }
 0xd5e   :  { %v2177_v10 = vpop.eup %2176 }
 0xd5f   :  { %v1405_v11 = vadd.f32 1.0, %v2177_v10 }
 0xd61   :  { %2178 = vrcp.f32 %v1405_v11 }
 0xd6e   :  { %v2179_v14 = vpop.eup %2178 }
 0xd6f   :  { %v1409_v18 = vmul.f32 %v2179_v14, %v1408_v16  ;;  %v1415_v38 = vsub.f32 1.0, %v2179_v14  ;;  %v1421_v41 = vmul.f32 %v2179_v14, %v1313_v0 }
 0xd71   :  { %v1413_v19 = vadd.f32 %v1411_v17, %v1409_v18 }
 0xd73   :  { %2180 = vtanh.f32 %v1413_v19 }
 0xd80   :  { %v2181_v20 = vpop.eup %2180 }
 0xd81   :  { %1417 = vrot.lane.b32.xlu0 %v2181_v20, %s2377_s21 }
 0xdf3   :  { %v1418_v39 = vpop.permute.xlu0 %1417 }
 0xdf4   :  { %v1420_v42 = vmul.f32 %v1418_v39, %v1415_v38 }
 0xdf6   :  { %v1422_v43 = vadd.f32 %v1421_v41, %v1420_v42 }
 0xdf8   :  { %v1430_v44 = vrot.slane %v1422_v43, %v2632_v4 }
 0xdfa   :  { %1431 = vrot.lane.b32.xlu1 %v1430_v44, %s2377_s21 }
 0xe6c   :  { %v1432_v45 = vpop.permute.xlu1 %1431 }
 0xe6d   :  { %1435 = vst.msk [vmem:[#allocation3 + $0xc] sm:$0x3] %vm780_vm13, %v1432_v45  ;;  %2027 = vmatmul.mubr.msk.f32.vlgmr.msra.gmra.mxu0 %vm665_vm14, %v1432_v45 }
 0xe6e   :  { %2121 = vmatprep.mubr.msk.f32.mxu0 %vm2378_vm5, %v2375_v21 }
 0xe74   :  { %v2853_v46 = vld [vmem:[#allocation3 + $0xc] sm:$0x3] }
 0xe75   :  { %v1580_v47 = vrot.slane %v2853_v46, 2 }
 0xe77   :  { %v1581_v48 = vsel %vm542_vm1, %v1580_v47, %v1579_v6 }
 0xf2d   :  { %v1504_v49 = vpop.f32.mrf.mxu0 }
 0xf2e   :  { %v1510_v56 = vadd.f32 %v1509_v55, %v1504_v49 }
 0xf2f   :  { %v1506_v25 = vpop.f32.mrf.mxu0 }
 0xf30   :  { %v2028_v57 = vmul.f32 -1.442695, %v1510_v56  ;;  %v1517_v26 = vadd.f32 %v2693_v40, %v1506_v25  ;;  %v1776_v40 = vsel %vm539_vm15, %v1570_v51, %v2761_v53 }
 0xf31   :  { %v1777_v37 = vsel %vm547_vm7, %v1572_v54, %v1776_v40 }
 0xf32   :  { %2182 = vpow2.f32 %v2028_v57  ;;  %v1778_v61 = vsel %vm540_vm0, %v1574_v15, %v1777_v37 }
 0xf33   :  { %v1779_v62 = vsel %vm549_vm10, %v1576_v23, %v1778_v61 }
 0xf3f   :  { %v2183_v58 = vpop.eup %2182 }
 0xf40   :  { %v1514_v24 = vadd.f32 1.0, %v2183_v58 }
 0xf42   :  { %2184 = vrcp.f32 %v1514_v24 }
 0xf4f   :  { %v2185_v27 = vpop.eup %2184 }
 0xf50   :  { %v1518_v29 = vmul.f32 %v2185_v27, %v1517_v26  ;;  %v1524_v32 = vsub.f32 1.0, %v2185_v27  ;;  %v1530_v34 = vmul.f32 %v2185_v27, %v1422_v43 }
 0xf52   :  { %v1522_v30 = vadd.f32 %v1520_v28, %v1518_v29 }
 0xf54   :  { %2186 = vtanh.f32 %v1522_v30 }
 0xf61   :  { %v2187_v31 = vpop.eup %2186 }
 0xf62   :  { %1526 = vrot.lane.b32.xlu0 %v2187_v31, %s2377_s21 }
 0xfd4   :  { %v1527_v33 = vpop.permute.xlu0 %1526 }
 0xfd5   :  { %v1529_v35 = vmul.f32 %v1527_v33, %v1524_v32 }
 0xfd7   :  { %v1531_v60 = vadd.f32 %v1530_v34, %v1529_v35 }
 0xfd9   :  { %v1539_v36 = vrot.slane %v1531_v60, %v2632_v4  ;;  %v1780_v4 = vsel %vm542_vm1, %v1578_v5, %v1779_v62 }
 0xfda   :  { %v1781_v63 = vsel %vm551_vm11, %v1580_v47, %v1780_v4 }
 0xfdb   :  { %1540 = vrot.lane.b32.xlu1 %v1539_v36, %s2377_s21  ;;  %v1785_v0 = vsel %vm1784_vm3, %v1781_v63, 0.0 }
 0xfff   :  { %1786 = vadd.xlane.f32.xlu1 %v1785_v0 }
0x104d   :  { %v1541_v51 = vpop.permute.xlu1 %1540 }
0x104e   :  { %1544 = vst.msk [vmem:[#allocation3 + $0xe] sm:$0x3] %vm780_vm13, %v1541_v51 }
0x1055   :  { %v2878_v54 = vld [vmem:[#allocation3 + $0xe] sm:$0x3] }
0x1056   :  { %v1582_v1 = vrot.slane %v2878_v54, 1 }
0x1058   :  { %v1583_v15 = vsel %vm551_vm11, %v1582_v1, %v1581_v48  ;;  %v1789_v23 = vsel %vm1788_vm4, %v1582_v1, 0.0 }
0x1059   :  { %v1585_v2 = vsel %vm665_vm14, %v1583_v15, 0.0 }
0x105a   :  { %1586 = vadd.xlane.f32.xlu0 %v1585_v2 }
0x105e   :  { %1790 = vadd.xlane.f32.xlu0 %v1789_v23 }
0x1088   :  { %v1787_v5 = vpop.xlane.xlu1 %1786 }
0x1089   :  { %v1792_v6 = vmul.f32 0.015625, %v1787_v5 }
0x108b   :  { %v1796_v22 = vrot.slane %v1792_v6, 1  ;;  %v1797_v7 = vrot.slane %v1792_v6, 2  ;;  %v1798_v8 = vrot.slane %v1792_v6, 3  ;;  %v1799_v9 = vrot.slane %v1792_v6, 4 }
0x108c   :  { %v1800_v10 = vrot.slane %v1792_v6, 5  ;;  %v1801_v11 = vrot.slane %v1792_v6, 6  ;;  %v2885_v12 = vsub.f32 %v2761_v53, %v1792_v6 }
0x108d   :  { %v2888_v16 = vsub.f32 %v2750_v50, %v1796_v22  ;;  %v2891_v14 = vsub.f32 %v2758_v52, %v1797_v7  ;;  %v2894_v17 = vsub.f32 %v2793_v13, %v1798_v8  ;;  %v2897_v18 = vsub.f32 %v2822_v59, %v1799_v9 }
0x108e   :  { %v2900_v19 = vsub.f32 %v2843_v3, %v1800_v10  ;;  %v2903_v20 = vsub.f32 %v2853_v46, %v1801_v11  ;;  %v1819_v43 = vmul.f32 %v2885_v12, %v2885_v12 }
0x108f   :  { %v1820_v38 = vmul.f32 %v2888_v16, %v2888_v16  ;;  %v1821_v39 = vmul.f32 %v2891_v14, %v2891_v14  ;;  %v1822_v41 = vmul.f32 %v2894_v17, %v2894_v17  ;;  %v1823_v42 = vmul.f32 %v2897_v18, %v2897_v18 }
0x1090   :  { %v1824_v44 = vmul.f32 %v2900_v19, %v2900_v19  ;;  %v1825_v48 = vmul.f32 %v2903_v20, %v2903_v20 }
0x1091   :  { %v1835_v45 = vrot.slane %v1820_v38, 7  ;;  %v1837_v47 = vrot.slane %v1821_v39, 6  ;;  %v1839_v55 = vrot.slane %v1822_v41, 5  ;;  %v1841_v57 = vrot.slane %v1823_v42, 4 }
0x1092   :  { %v1843_v24 = vrot.slane %v1824_v44, 3  ;;  %v1845_v26 = vrot.slane %v1825_v48, 2 }
0x1093   :  { %v1836_v49 = vsel %vm539_vm15, %v1835_v45, %v1819_v43 }
0x1094   :  { %v1838_v56 = vsel %vm547_vm7, %v1837_v47, %v1836_v49 }
0x1095   :  { %v1840_v58 = vsel %vm540_vm0, %v1839_v55, %v1838_v56  ;;  %v1560_v56 = vld [vmem:[%s3074_s11 + $0x38] sm:$0xff] }
0x1096   :  { %v1842_v25 = vsel %vm549_vm10, %v1841_v57, %v1840_v58  ;;  %2106 = vmatpush3.msra.mxu0 %v1560_v56  ;;  %2087 = vmatpush3.msra.mxu1 %v1560_v56  ;;  %v1559_v57 = vld [vmem:[%s3074_s11 + $0x30] sm:$0xff]  ;;  %v1558_v58 = vld [vmem:[%s3074_s11 + $0x28] sm:$0xff] }
0x1097   :  { %v1844_v27 = vsel %vm542_vm1, %v1843_v24, %v1842_v25  ;;  %2107 = vmatprep.subr.mxu0 %v2375_v21  ;;  %2088 = vmatprep.subr.mxu1 %v2375_v21  ;;  %v1557_v24 = vld [vmem:[%s3074_s11 + $0x20] sm:$0xff]  ;;  %v1556_v25 = vld [vmem:[%s3074_s11 + $0x18] sm:$0xff] }
0x1098   :  { %v1846_v28 = vsel %vm551_vm11, %v1845_v26, %v1844_v27  ;;  %2108 = vmatpush3.msra.mxu0 %v1559_v57  ;;  %2089 = vmatpush3.msra.mxu1 %v1559_v57  ;;  %v1555_v26 = vld [vmem:[%s3074_s11 + $0x10] sm:$0xff]  ;;  %v1554_v27 = vld [vmem:[%s3074_s11 + $0x8] sm:$0xff] }
0x1099   :  { %v1850_v29 = vsel %vm1784_vm3, %v1846_v28, 0.0  ;;  %2109 = vmatprep.subr.mxu0 %v2375_v21  ;;  %2090 = vmatprep.subr.mxu1 %v2375_v21  ;;  %v1553_v28 = vld [vmem:[%s3074_s11] sm:$0xff] }
0x109a   :  { %1851 = vadd.xlane.f32.xlu1 %v1850_v29  ;;  %2110 = vmatpush3.msra.mxu0 %v1558_v58 }
0x109b   :  { %2091 = vmatpush3.msra.mxu1 %v1558_v58  ;;  %2111 = vmatprep.subr.mxu0 %v2375_v21 }
0x109c   :  { %2092 = vmatprep.subr.mxu1 %v2375_v21  ;;  %2112 = vmatpush3.msra.mxu0 %v1557_v24 }
0x109d   :  { %2093 = vmatpush3.msra.mxu1 %v1557_v24  ;;  %2113 = vmatprep.subr.mxu0 %v2375_v21 }
0x109e   :  { %2094 = vmatprep.subr.mxu1 %v2375_v21  ;;  %2114 = vmatpush3.msra.mxu0 %v1556_v25 }
0x109f   :  { %2095 = vmatpush3.msra.mxu1 %v1556_v25  ;;  %2115 = vmatprep.subr.mxu0 %v2375_v21 }
0x10a0   :  { %2096 = vmatprep.subr.mxu1 %v2375_v21  ;;  %2116 = vmatpush3.msra.mxu0 %v1555_v26 }
0x10a1   :  { %2097 = vmatpush3.msra.mxu1 %v1555_v26  ;;  %2117 = vmatprep.subr.mxu0 %v2375_v21 }
0x10a2   :  { %2098 = vmatprep.subr.mxu1 %v2375_v21  ;;  %2118 = vmatpush3.msra.mxu0 %v1554_v27 }
0x10a3   :  { %2099 = vmatpush3.msra.mxu1 %v1554_v27  ;;  %2119 = vmatprep.subr.mxu0 %v2375_v21 }
0x10a4   :  { %2120 = vmatpush3.msra.mxu0 %v1553_v28  ;;  %2100 = vmatprep.subr.mxu1 %v2375_v21 }
0x10a5   :  { %2101 = vmatpush3.msra.mxu1 %v1553_v28 }
0x10e3   :  { %v1587_v30 = vpop.xlane.xlu0 %1586 }
0x10e4   :  { %v1589_v31 = vmul.f32 0.015625, %v1587_v30 }
0x10e6   :  { %v1591_v32 = vrot.slane %v1589_v31, 1  ;;  %v1592_v33 = vrot.slane %v1589_v31, 2  ;;  %v1593_v34 = vrot.slane %v1589_v31, 3  ;;  %v1594_v35 = vrot.slane %v1589_v31, 4 }
0x10e7   :  { %v1791_v60 = vpop.xlane.xlu0 %1790  ;;  %v1595_v36 = vrot.slane %v1589_v31, 5  ;;  %v1596_v40 = vrot.slane %v1589_v31, 6  ;;  %v1597_v37 = vrot.slane %v1589_v31, 7  ;;  %v2927_v61 = vsub.f32 %v2761_v53, %v1589_v31 }
0x10e8   :  { %v1793_v62 = vmul.f32 0.015625, %v1791_v60  ;;  %v2930_v4 = vsub.f32 %v2750_v50, %v1591_v32  ;;  %v2933_v63 = vsub.f32 %v2758_v52, %v1592_v33  ;;  %v2936_v0 = vsub.f32 %v2793_v13, %v1593_v34 }
0x10e9   :  { %v2939_v51 = vsub.f32 %v2822_v59, %v1594_v35  ;;  %v2942_v1 = vsub.f32 %v2843_v3, %v1595_v36  ;;  %v2945_v15 = vsub.f32 %v2853_v46, %v1596_v40  ;;  %v2948_v2 = vsub.f32 %v2878_v54, %v1597_v37 }
0x10ea   :  { %v1802_v53 = vrot.slane %v1793_v62, 7  ;;  %v1615_v50 = vmul.f32 %v2930_v4, %v2930_v4  ;;  %v1616_v52 = vmul.f32 %v2933_v63, %v2933_v63  ;;  %v1617_v13 = vmul.f32 %v2936_v0, %v2936_v0 }
0x10eb   :  { %v1618_v59 = vmul.f32 %v2939_v51, %v2939_v51  ;;  %v1614_v3 = vmul.f32 %v2927_v61, %v2927_v61  ;;  %v1619_v46 = vmul.f32 %v2942_v1, %v2942_v1  ;;  %v1620_v22 = vmul.f32 %v2945_v15, %v2945_v15 }
0x10ec   :  { %v1630_v23 = vrot.slane %v1615_v50, 7  ;;  %v1632_v5 = vrot.slane %v1616_v52, 6  ;;  %v2963_v6 = vsub.f32 %v2878_v54, %v1802_v53  ;;  %v1621_v7 = vmul.f32 %v2948_v2, %v2948_v2 }
0x10ed   :  { %v1634_v9 = vrot.slane %v1617_v13, 5  ;;  %v1636_v11 = vrot.slane %v1618_v59, 4  ;;  %v1638_v39 = vrot.slane %v1619_v46, 3  ;;  %v1640_v42 = vrot.slane %v1620_v22, 2 }
0x10ee   :  { %v1631_v8 = vsel %vm545_vm6, %v1630_v23, %v1614_v3  ;;  %v1826_v54 = vmul.f32 %v2963_v6, %v2963_v6  ;;  %v1642_v44 = vrot.slane %v1621_v7, 1 }
0x10ef   :  { %v1633_v10 = vsel %vm539_vm15, %v1632_v5, %v1631_v8 }
0x10f0   :  { %v1635_v38 = vsel %vm547_vm7, %v1634_v9, %v1633_v10  ;;  %v1847_v49 = vrot.slane %v1826_v54, 1 }
0x10f1   :  { %v1637_v41 = vsel %vm540_vm0, %v1636_v11, %v1635_v38 }
0x10f2   :  { %v1639_v43 = vsel %vm549_vm10, %v1638_v39, %v1637_v41  ;;  %v1853_v55 = vsel %vm1788_vm4, %v1847_v49, 0.0 }
0x10f3   :  { %v1641_v45 = vsel %vm542_vm1, %v1640_v42, %v1639_v43 }
0x10f4   :  { %v1643_v47 = vsel %vm551_vm11, %v1642_v44, %v1641_v45 }
0x10f5   :  { %v1645_v48 = vsel %vm665_vm14, %v1643_v47, 0.0 }
0x10f6   :  { %1646 = vadd.xlane.f32.xlu0 %v1645_v48 }
0x10fa   :  { %1854 = vadd.xlane.f32.xlu0 %v1853_v55 }
0x1123   :  { %v1852_v29 = vpop.xlane.xlu1 %1851 }
0x1124   :  { %v1856_v30 = vmul.f32 0.015625, %v1852_v29 }
0x1126   :  { %v1858_v31 = vadd.f32 1e-05, %v1856_v30 }
0x1128   :  { %2188 = vrsqrt.f32 %v1858_v31 }
0x1135   :  { %v2189_v32 = vpop.eup %2188 }
0x1136   :  { %v1865_v35 = vrot.slane %v2189_v32, 2  ;;  %v1864_v36 = vrot.slane %v2189_v32, 1  ;;  %v1879_v40 = vmul.f32 %v2189_v32, %v2885_v12  ;;  %v1866_v53 = vrot.slane %v2189_v32, 3 }
0x1137   :  { %v1867_v3 = vrot.slane %v2189_v32, 4  ;;  %v1868_v22 = vrot.slane %v2189_v32, 5  ;;  %v1869_v9 = vrot.slane %v2189_v32, 6 }
0x1138   :  { %v1881_v50 = vmul.f32 %v1865_v35, %v2891_v14  ;;  %v1880_v21 = vmul.f32 %v1864_v36, %v2888_v16  ;;  %v1895_v13 = vrot.slane %v1879_v40, 1  ;;  %v1882_v59 = vmul.f32 %v1866_v53, %v2894_v17  ;;  %v2029_v35 = vld [vmem:[%s3075_s12] ss:$0 sm:$0xff] }
0x1139   :  { %v1883_v12 = vmul.f32 %v1867_v3, %v2897_v18  ;;  %v1884_v16 = vmul.f32 %v1868_v22, %v2900_v19  ;;  %v1885_v48 = vmul.f32 %v1869_v9, %v2903_v20 }
0x113a   :  { %v1897_v46 = vrot.slane %v1881_v50, 7  ;;  %v1896_v23 = vsel %vm545_vm6, %v1880_v21, %v1895_v13  ;;  %v1899_v5 = vrot.slane %v1882_v59, 6 }
0x113b   :  { %v1901_v10 = vrot.slane %v1883_v12, 5  ;;  %v1903_v19 = vrot.slane %v1884_v16, 4  ;;  %v1905_v27 = vrot.slane %v1885_v48, 3 }
0x113c   :  { %v1898_v7 = vsel %vm539_vm15, %v1897_v46, %v1896_v23 }
0x113d   :  { %v1900_v8 = vsel %vm547_vm7, %v1899_v5, %v1898_v7 }
0x113e   :  { %v1902_v41 = vsel %vm540_vm0, %v1901_v10, %v1900_v8 }
0x113f   :  { %v1904_v25 = vsel %vm549_vm10, %v1903_v19, %v1902_v41 }
0x1140   :  { %v1906_v30 = vsel %vm542_vm1, %v1905_v27, %v1904_v25 }
0x117f   :  { %v1647_v33 = vpop.xlane.xlu0 %1646 }
0x1180   :  { %v1648_v34 = vmul.f32 0.015625, %v1647_v33 }
0x1182   :  { %v1649_v60 = vadd.f32 1e-05, %v1648_v34 }
0x1183   :  { %v1855_v37 = vpop.xlane.xlu0 %1854 }
0x1184   :  { %2190 = vrsqrt.f32 %v1649_v60  ;;  %v1857_v62 = vmul.f32 0.015625, %v1855_v37 }
0x1186   :  { %v1859_v52 = vadd.f32 1e-05, %v1857_v62 }
0x1188   :  { %2192 = vrsqrt.f32 %v1859_v52 }
0x1191   :  { %v2191_v14 = vpop.eup %2190 }
0x1192   :  { %v1652_v11 = vrot.slane %v2191_v14, 1  ;;  %v1653_v38 = vrot.slane %v2191_v14, 2  ;;  %v1654_v17 = vrot.slane %v2191_v14, 3  ;;  %v1655_v39 = vrot.slane %v2191_v14, 4 }
0x1193   :  { %v1656_v42 = vrot.slane %v2191_v14, 5  ;;  %v1657_v54 = vrot.slane %v2191_v14, 6  ;;  %v1658_v43 = vrot.slane %v2191_v14, 7  ;;  %v1667_v49 = vmul.f32 %v2191_v14, %v2927_v61 }
0x1194   :  { %v1668_v18 = vmul.f32 %v1652_v11, %v2930_v4  ;;  %v1669_v44 = vmul.f32 %v1653_v38, %v2933_v63  ;;  %v1670_v45 = vmul.f32 %v1654_v17, %v2936_v0  ;;  %v1671_v55 = vmul.f32 %v1655_v39, %v2939_v51 }
0x1195   :  { %v2193_v47 = vpop.eup %2192  ;;  %v1672_v57 = vmul.f32 %v1656_v42, %v2942_v1  ;;  %v1673_v4 = vmul.f32 %v1657_v54, %v2945_v15  ;;  %v1674_v0 = vmul.f32 %v1658_v43, %v2948_v2 }
0x1196   :  { %v1870_v56 = vrot.slane %v2193_v47, 7  ;;  %v1689_v58 = vrot.slane %v1668_v18, 7  ;;  %v1691_v24 = vrot.slane %v1669_v44, 6  ;;  %v1693_v26 = vrot.slane %v1670_v45, 5 }
0x1197   :  { %v1695_v51 = vrot.slane %v1671_v55, 4  ;;  %v1697_v29 = vrot.slane %v1672_v57, 3  ;;  %v1699_v15 = vrot.slane %v1673_v4, 2  ;;  %v1701_v32 = vrot.slane %v1674_v0, 1 }
0x1198   :  { %v1886_v63 = vmul.f32 %v1870_v56, %v2963_v6  ;;  %v1690_v20 = vsel %vm545_vm6, %v1689_v58, %v1667_v49 }
0x1199   :  { %v1692_v61 = vsel %vm539_vm15, %v1691_v24, %v1690_v20 }
0x119a   :  { %v1907_v28 = vrot.slane %v1886_v63, 2  ;;  %v1694_v1 = vsel %vm547_vm7, %v1693_v26, %v1692_v61 }
0x119b   :  { %v1696_v31 = vsel %vm540_vm0, %v1695_v51, %v1694_v1 }
0x119c   :  { %v1908_v6 = vsel %vm551_vm11, %v1907_v28, %v1906_v30  ;;  %v1698_v2 = vsel %vm549_vm10, %v1697_v29, %v1696_v31 }
0x119d   :  { %2122 = vmatmul.mubr.msk.f32.vlgmr.msra.gmra.mxu0 %vm665_vm14, %v1908_v6  ;;  %v1700_v33 = vsel %vm542_vm1, %v1699_v15, %v1698_v2 }
0x119e   :  { %v1702_v34 = vsel %vm551_vm11, %v1701_v32, %v1700_v33 }
0x119f   :  { %2103 = vmatmul.mubr.msk.f32.vlgmr.msra.gmra.mxu1 %vm665_vm14, %v1702_v34 }
0x125d   :  { %v1977_v60 = vpop.f32.mrf.mxu0 }
0x125e   :  { %v1978_v36 = vadd.f32 %v2029_v35, %v1977_v60 }
0x125f   :  { %v1771_v40 = vpop.f32.mrf.mxu1  ;;  %v2123_v37 = vpop.f32.mrf.mxu0 }
0x1260   :  { %1982 = vst.msk [vmem:[#allocation16 + $0x8] sm:$0xff] %vm231_vm2, %v1978_v36  ;;  %v1772_v62 = vadd.f32 %v2029_v35, %v1771_v40 }
0x1261   :  { %v2104_v53 = vpop.f32.mrf.mxu1 }
0x1262   :  { %1775 = vst.msk [vmem:[#allocation16] sm:$0xff] %vm231_vm2, %v1772_v62 }
0x1263   :  { %2345 = shalt.err (!%p2342_p11)
}
0x1264   :  { %1994 = dma.vmem_to_hbm [thread:$0]  %s1989_s16, 256, %s3076_s13, [#allocation6], %s2366_s30, %s2366_s30, %s2367_s14  }
0x1265   :  { %2362 = dma.done.wait [#allocation6], 256  }
0x1266   :  { %2363 = vsyncadd [#allocation6], 4294967040 }
0x1267   :  { %1998 = vsyncpa [#allocation5], 1 }
0x1268   :  { %1999 = vsyncpa [#allocation8], 1 }
0x1269   :  { %2000 = vsyncpa [#allocation11], 1 }
0x126a   :  { %2001 = vsyncpa [#allocation14], 1 }
0x126b   :  { %2002 = vsyncpa [#allocation6], 1 }

</bundles_post_ra>
